<compile_context>
chip_gen: v7x
topology: tpu7x:2x2x1
jax: 0.10.0
libtpu: 0.0.40
codegen_flags: <defaults>
</compile_context>

<pallas_src>
import functools
import math

import numpy as np

import jax
import jax.numpy as jnp
from jax import lax
from jax.experimental import pallas as pl
from jax.experimental.pallas import tpu as pltpu


def _leaky_relu(x):
    return jnp.where(x >= 0, x, 0.2 * x)


@functools.lru_cache(maxsize=None)
def _spatial_constants_np(H, W):
    """Boundary masks for the 9 conv taps and the 2x2-pool selection matrix."""
    HW = H * W
    ys, xs = np.divmod(np.arange(HW), W)
    masks = []
    for dy in (-1, 0, 1):
        for dx in (-1, 0, 1):
            m = ((ys + dy >= 0) & (ys + dy < H) & (xs + dx >= 0) & (xs + dx < W))
            masks.append(m.astype(np.float32))
    masks = np.stack(masks)                              # (9, HW)

    Hh, Wh = H // 2, W // 2
    sel = np.zeros((HW, Hh * Wh), np.float32)            # picks the 2x2 top-lefts
    for j in range(Hh * Wh):
        yj, xj = divmod(j, Wh)
        sel[(2 * yj) * W + 2 * xj, j] = 1.0
    return masks, sel


def _make_dblock_kernel(H, W, C, F, M, num_heads):
    assert C % num_heads == 0
    HW = H * W
    HW4 = (H // 2) * (W // 2)
    ch = C // num_heads
    temperature = 1.0 / math.sqrt(C)                      # fixed, as in the module
    # tap t = (dy+1)*3 + (dx+1)  <=>  PyTorch conv weight.reshape(C, 9) ordering
    taps = tuple((dy, dx) for dy in (-1, 0, 1) for dx in (-1, 0, 1))

    def instance_norm(v):
        # nn.InstanceNorm2d(affine=False): per-channel over spatial, biased var.
        mean = jnp.mean(v, axis=-1, keepdims=True)
        cv = v - mean
        var = jnp.mean(cv * cv, axis=-1, keepdims=True)
        return cv * lax.rsqrt(var + 1e-5)

    def kernel(x_ref, masks_ref, sel_ref,
               qkv_w_ref, qkv_b_ref, qkv_dw_w_ref, qkv_dw_b_ref,
               wap_ref, pw_wb_ref, pw_b_ref,
               dw_w_ref, dw_b_ref,
               ffn_pw1_w_ref, ffn_pw1_b_ref, ffn_dw_w_ref, ffn_dw_b_ref,
               ffn_pw2_w_ref, ffn_pw2_b_ref,
               out_w_ref, out_b_ref,
               r_ref, y_ref):
        x = x_ref[...]                                    # (C, HW), lane-dense
        masks = masks_ref[...]                            # (9, HW), 0/1

        def shifted(v, t):
            # v[:, p + dy*W + dx], zero outside the image: lane roll on the XLU
            # (overlaps with VALU FMAs) + boundary mask.  No pad scratch.
            dy, dx = taps[t]
            d = dy * W + dx
            rolled = pltpu.roll(v, shift=(-d) % HW, axis=1)
            return rolled * masks[t:t + 1, :]

        def dwconv3x3(v, w, b):
            # Depthwise 3x3, padding=1.  v:(Ck,HW)  w:(Ck,9)  b:(Ck,1)
            acc = v * w[:, 4:5] + b                       # center tap + bias
            for t in range(9):
                if t == 4:
                    continue
                acc = acc + shifted(v, t) * w[:, t:t + 1]
            return acc

        # ---- stage 1: norm1 + SA + depthwise branch + pw fuse + residual ----
        xn = instance_norm(x)

        qkv = jnp.dot(qkv_w_ref[...], xn,
                      preferred_element_type=jnp.float32) + qkv_b_ref[...]
        qkv = dwconv3x3(qkv, qkv_dw_w_ref[...], qkv_dw_b_ref[...])   # (3C, HW)

        # Per-head channel attention.  Layout (ch, HW) matches the PyTorch
        # rearrange directly, so there are no transposes; project_out is folded
        # into the pw weight, so each head accumulates into `att` (no concat).
        wap = wap_ref[...]                                # (C, C) = pw_wa @ proj_w
        att = None
        for h in range(num_heads):
            s = h * ch
            q = qkv[s:s + ch]
            k = qkv[C + s:C + s + ch]
            v = qkv[2 * C + s:2 * C + s + ch]
            qn = q / jnp.maximum(jnp.sqrt(jnp.sum(q * q, -1, keepdims=True)), 1e-12)
            kn = k / jnp.maximum(jnp.sqrt(jnp.sum(k * k, -1, keepdims=True)), 1e-12)
            a = lax.dot_general(qn, kn, (((1,), (1,)), ((), ())),
                                preferred_element_type=jnp.float32) * temperature
            a = a - jnp.max(a, axis=-1, keepdims=True)
            e = jnp.exp(a)
            p = e / jnp.sum(e, axis=-1, keepdims=True)    # exact softmax denom
            o = jnp.dot(p, v, preferred_element_type=jnp.float32)     # (ch, HW)
            contrib = jnp.dot(wap[:, s:s + ch], o,
                              preferred_element_type=jnp.float32)
            att = contrib if att is None else att + contrib

        x_dw = _leaky_relu(dwconv3x3(xn, dw_w_ref[...], dw_b_ref[...]))

        # pw(cat([proj(o), x_dw])) with project_out folded: att + Wb@x_dw + b_fold
        fused = (att
                 + jnp.dot(pw_wb_ref[...], x_dw, preferred_element_type=jnp.float32)
                 + pw_b_ref[...])
        x1 = x + fused

        # ---- stage 2: norm2 + FFN (pw1 -> dw3x3 -> GELU -> pw2) + residual ---
        x1n = instance_norm(x1)
        hid = jnp.dot(ffn_pw1_w_ref[...], x1n,
                      preferred_element_type=jnp.float32) + ffn_pw1_b_ref[...]
        hid = dwconv3x3(hid, ffn_dw_w_ref[...], ffn_dw_b_ref[...])
        # TODO(synk): PyTorch nn.GELU default is exact (erf); tanh approximation used.
        hid = jax.nn.gelu(hid, approximate=True)
        x2 = x1 + (jnp.dot(ffn_pw2_w_ref[...], hid,
                           preferred_element_type=jnp.float32) + ffn_pw2_b_ref[...])

        # ---- stage 3: out_conv 3x3 (9 accumulating dots) + LeakyReLU ---------
        w_out = out_w_ref[...]                            # (9, F, C)
        acc = jnp.dot(w_out[4], x2,
                      preferred_element_type=jnp.float32) + out_b_ref[...]
        for t in range(9):
            if t == 4:
                continue
            acc = acc + jnp.dot(w_out[t], shifted(x2, t),
                                preferred_element_type=jnp.float32)
        r = _leaky_relu(acc)                              # (F, HW)
        r_ref[...] = r

        # ---- fused 2x2 max-pool (nn.MaxPool2d(2)) ----------------------------
        # TODO(synk): assumes even H and W (MaxPool2d floor semantics otherwise differ).
        hmax = jnp.maximum(r, pltpu.roll(r, shift=HW - 1, axis=1))       # max(p, p+1)
        vmax = jnp.maximum(hmax, pltpu.roll(hmax, shift=HW - W, axis=1)) # 2x2 max at top-lefts
        # compact the 2x2 top-left maxima to (F, HW/4) with a constant 0/1
        # selection matmul (MXU) -- avoids lane gathers / reshape relayouts.
        y_ref[...] = jnp.dot(vmax, sel_ref[...], preferred_element_type=jnp.float32)

    return kernel


def dblock_forward(x_nchw, params, num_heads=1):
    """Fused DBlock forward.  Returns (y, r) in NCHW like the PyTorch module."""
    B, C, H, W = x_nchw.shape
    assert H % 2 == 0 and W % 2 == 0
    HW, HW4 = H * W, (H // 2) * (W // 2)
    F = params['out_b'].shape[0]
    M = params['ffn_pw1_w'].shape[0]

    # Channels-first, spatially-flattened layout: free row-major reshape.
    x = x_nchw.reshape(B, C, HW)

    masks_np, sel_np = _spatial_constants_np(H, W)
    masks = jnp.asarray(masks_np)
    sel = jnp.asarray(sel_np)

    # Fold project_out into the pw fuse (trace-time (C,C) matmuls):
    #   pw(cat[proj(o), x_dw]) = (Wa@proj_w)@o + Wb@x_dw + (Wa@proj_b + pw_b)
    pw_wa = params['pw_w'][:, :C]
    pw_wb = params['pw_w'][:, C:]
    wap = pw_wa @ params['proj_w']
    pw_b_fold = pw_wa @ params['proj_b'] + params['pw_b']

    kernel = _make_dblock_kernel(H, W, C, F, M, num_heads)

    c2 = lambda b: (0, 0)
    c3 = lambda b: (0, 0, 0)
    r, y = pl.pallas_call(
        kernel,
        # grid=(B,) splits evenly across v7x's 2 TensorCores for even B; for
        # B==1 add a "parallel" spatial-tile axis to keep both TCs busy.
        grid=(B,),
        in_specs=[
            pl.BlockSpec((None, C, HW), lambda b: (b, 0, 0)),        # x (per batch)
            pl.BlockSpec((9, HW), c2),                               # tap masks
            pl.BlockSpec((HW, HW4), c2),                             # pool select
            pl.BlockSpec((3 * C, C), c2), pl.BlockSpec((3 * C, 1), c2),   # qkv 1x1
            pl.BlockSpec((3 * C, 9), c2), pl.BlockSpec((3 * C, 1), c2),   # qkv dw3x3
            pl.BlockSpec((C, C), c2), pl.BlockSpec((C, C), c2),           # wap, pw_wb
            pl.BlockSpec((C, 1), c2),                                     # folded bias
            pl.BlockSpec((C, 9), c2), pl.BlockSpec((C, 1), c2),           # dw branch
            pl.BlockSpec((M, C), c2), pl.BlockSpec((M, 1), c2),           # ffn pw1
            pl.BlockSpec((M, 9), c2), pl.BlockSpec((M, 1), c2),           # ffn dw3x3
            pl.BlockSpec((C, M), c2), pl.BlockSpec((C, 1), c2),           # ffn pw2
            pl.BlockSpec((9, F, C), c3), pl.BlockSpec((F, 1), c2),        # out conv
        ],
        out_specs=[
            pl.BlockSpec((None, F, HW), lambda b: (b, 0, 0)),        # r (lane-dense)
            pl.BlockSpec((None, F, HW4), lambda b: (b, 0, 0)),       # pooled y
        ],
        out_shape=[
            jax.ShapeDtypeStruct((B, F, HW), jnp.float32),
            jax.ShapeDtypeStruct((B, F, HW4), jnp.float32),
        ],
        compiler_params=pltpu.CompilerParams(
            dimension_semantics=("parallel",),
            vmem_limit_bytes=32 * 1024 * 1024,
        ),
    )(x, masks, sel,
      params['qkv_w'], params['qkv_b'], params['qkv_dw_w'], params['qkv_dw_b'],
      wap, pw_wb, pw_b_fold,
      params['dw_w'], params['dw_b'],
      params['ffn_pw1_w'], params['ffn_pw1_b'],
      params['ffn_dw_w'], params['ffn_dw_b'],
      params['ffn_pw2_w'], params['ffn_pw2_b'],
      params['out_w'], params['out_b'])

    return y.reshape(B, F, H // 2, W // 2), r.reshape(B, F, H, W)


# ------------------------------- parameters ----------------------------------
def init_params(key, C, F, mid):
    """Channels-first weights.  Depthwise 3x3 weights are stored (Ck, 9) with
    tap order ky*3+kx (== PyTorch weight.reshape(Ck, 9)); out_conv is (9, F, C)."""
    ks = jax.random.split(key, 18)

    def w(k, shape, s=0.1):
        return jax.random.normal(k, shape, jnp.float32) * s

    return {
        # SA(dim=C, num_heads, bias=True)
        'qkv_w': w(ks[0], (3 * C, C)),
        'qkv_b': w(ks[1], (3 * C, 1), 0.01),
        'qkv_dw_w': w(ks[2], (3 * C, 9)),
        'qkv_dw_b': w(ks[3], (3 * C, 1), 0.01),
        'proj_w': w(ks[4], (C, C)),
        'proj_b': w(ks[5], (C, 1), 0.01),
        # depthwise branch + pw fuse
        'dw_w': w(ks[6], (C, 9)),
        'dw_b': w(ks[7], (C, 1), 0.01),
        'pw_w': w(ks[8], (C, 2 * C)),
        'pw_b': w(ks[9], (C, 1), 0.01),
        # FFN(C, mid, C)
        'ffn_pw1_w': w(ks[10], (mid, C)),
        'ffn_pw1_b': w(ks[11], (mid, 1), 0.01),
        'ffn_dw_w': w(ks[12], (mid, 9)),
        'ffn_dw_b': w(ks[13], (mid, 1), 0.01),
        'ffn_pw2_w': w(ks[14], (C, mid)),
        'ffn_pw2_b': w(ks[15], (C, 1), 0.01),
        # out_conv: Conv2d(C, F, 3, padding=1)
        'out_w': w(ks[16], (9, F, C)),
        'out_b': w(ks[17], (F, 1), 0.01),
    }


if __name__ == "__main__":
    key = jax.random.PRNGKey(0)
    B, C_in, H, W = 2, 4, 16, 16
    features = 8                                   # out_features == mid_features
    kx, kp = jax.random.split(key)
    x = jax.random.normal(kx, (B, C_in, H, W), jnp.float32)
    params = init_params(kp, C_in, features, features)

    fwd = jax.jit(functools.partial(dblock_forward, num_heads=1))
    y, r = fwd(x, params)
    y = jax.block_until_ready(y)
    r = jax.block_until_ready(r)

    assert y.shape == (B, features, H // 2, W // 2), y.shape
    assert r.shape == (B, features, H, W), r.shape
    assert bool(jnp.all(jnp.isfinite(y))) and bool(jnp.all(jnp.isfinite(r)))
    print("KERNEL_OK")
</pallas_src>

<mosaic_0001>
module attributes {stable_mosaic.version = 11 : i64} {
  func.func @kernel(%arg0: i32, %arg1: memref<1x4x256xf32, #tpu.memory_space<vmem>>, %arg2: memref<9x256xf32, #tpu.memory_space<vmem>>, %arg3: memref<256x64xf32, #tpu.memory_space<vmem>>, %arg4: memref<12x4xf32, #tpu.memory_space<vmem>>, %arg5: memref<12x1xf32, #tpu.memory_space<vmem>>, %arg6: memref<12x9xf32, #tpu.memory_space<vmem>>, %arg7: memref<12x1xf32, #tpu.memory_space<vmem>>, %arg8: memref<4x4xf32, #tpu.memory_space<vmem>>, %arg9: memref<4x4xf32, #tpu.memory_space<vmem>>, %arg10: memref<4x1xf32, #tpu.memory_space<vmem>>, %arg11: memref<4x9xf32, #tpu.memory_space<vmem>>, %arg12: memref<4x1xf32, #tpu.memory_space<vmem>>, %arg13: memref<8x4xf32, #tpu.memory_space<vmem>>, %arg14: memref<8x1xf32, #tpu.memory_space<vmem>>, %arg15: memref<8x9xf32, #tpu.memory_space<vmem>>, %arg16: memref<8x1xf32, #tpu.memory_space<vmem>>, %arg17: memref<4x8xf32, #tpu.memory_space<vmem>>, %arg18: memref<4x1xf32, #tpu.memory_space<vmem>>, %arg19: memref<9x8x4xf32, #tpu.memory_space<vmem>>, %arg20: memref<8x1xf32, #tpu.memory_space<vmem>>, %arg21: memref<1x8x256xf32, #tpu.memory_space<vmem>>, %arg22: memref<1x8x64xf32, #tpu.memory_space<vmem>>) attributes {dimension_semantics = [#tpu.dimension_semantics<parallel>], iteration_bounds = array<i64: 2>, scalar_prefetch = 0 : i64, scratch_operands = 0 : i64, tpu.core_type = #tpu.core_type<tc>, window_params = [{transform_indices = @transform_0, window_bounds = array<i64: 1, 4, 256>}, {pipeline_mode = #tpu.pipeline_mode<synchronous>, transform_indices = @transform_1, window_bounds = array<i64: 9, 256>}, {pipeline_mode = #tpu.pipeline_mode<synchronous>, transform_indices = @transform_2, window_bounds = array<i64: 256, 64>}, {pipeline_mode = #tpu.pipeline_mode<synchronous>, transform_indices = @transform_3, window_bounds = array<i64: 12, 4>}, {pipeline_mode = #tpu.pipeline_mode<synchronous>, transform_indices = @transform_4, window_bounds = array<i64: 12, 1>}, {pipeline_mode = #tpu.pipeline_mode<synchronous>, transform_indices = @transform_5, window_bounds = array<i64: 12, 9>}, {pipeline_mode = #tpu.pipeline_mode<synchronous>, transform_indices = @transform_6, window_bounds = array<i64: 12, 1>}, {pipeline_mode = #tpu.pipeline_mode<synchronous>, transform_indices = @transform_7, window_bounds = array<i64: 4, 4>}, {pipeline_mode = #tpu.pipeline_mode<synchronous>, transform_indices = @transform_8, window_bounds = array<i64: 4, 4>}, {pipeline_mode = #tpu.pipeline_mode<synchronous>, transform_indices = @transform_9, window_bounds = array<i64: 4, 1>}, {pipeline_mode = #tpu.pipeline_mode<synchronous>, transform_indices = @transform_10, window_bounds = array<i64: 4, 9>}, {pipeline_mode = #tpu.pipeline_mode<synchronous>, transform_indices = @transform_11, window_bounds = array<i64: 4, 1>}, {pipeline_mode = #tpu.pipeline_mode<synchronous>, transform_indices = @transform_12, window_bounds = array<i64: 8, 4>}, {pipeline_mode = #tpu.pipeline_mode<synchronous>, transform_indices = @transform_13, window_bounds = array<i64: 8, 1>}, {pipeline_mode = #tpu.pipeline_mode<synchronous>, transform_indices = @transform_14, window_bounds = array<i64: 8, 9>}, {pipeline_mode = #tpu.pipeline_mode<synchronous>, transform_indices = @transform_15, window_bounds = array<i64: 8, 1>}, {pipeline_mode = #tpu.pipeline_mode<synchronous>, transform_indices = @transform_16, window_bounds = array<i64: 4, 8>}, {pipeline_mode = #tpu.pipeline_mode<synchronous>, transform_indices = @transform_17, window_bounds = array<i64: 4, 1>}, {pipeline_mode = #tpu.pipeline_mode<synchronous>, transform_indices = @transform_18, window_bounds = array<i64: 9, 8, 4>}, {pipeline_mode = #tpu.pipeline_mode<synchronous>, transform_indices = @transform_19, window_bounds = array<i64: 8, 1>}, {transform_indices = @transform_20, window_bounds = array<i64: 1, 8, 256>}, {transform_indices = @transform_21, window_bounds = array<i64: 1, 8, 64>}]} {
    %c0 = arith.constant 0 : index
    %c0_0 = arith.constant 0 : index
    %c0_1 = arith.constant 0 : index
    %0 = vector.load %arg1[%c0, %c0_0, %c0_1] : memref<1x4x256xf32, #tpu.memory_space<vmem>>, vector<1x4x256xf32>
    %1 = vector.shape_cast %0 : vector<1x4x256xf32> to vector<4x256xf32>
    %c0_2 = arith.constant 0 : index
    %c0_3 = arith.constant 0 : index
    %2 = vector.load %arg2[%c0_2, %c0_3] : memref<9x256xf32, #tpu.memory_space<vmem>>, vector<9x256xf32>
    %cst = arith.constant dense<0.000000e+00> : vector<4xf32>
    %3 = vector.multi_reduction <add>, %1, %cst [1] : vector<4x256xf32> to vector<4xf32>
    %4 = vector.shape_cast %3 : vector<4xf32> to vector<4x1xf32>
    %cst_4 = arith.constant 2.560000e+02 : f32
    %5 = vector.broadcast %cst_4 : f32 to vector<4x1xf32>
    %6 = arith.divf %4, %5 : vector<4x1xf32>
    %7 = vector.broadcast %6 : vector<4x1xf32> to vector<4x256xf32>
    %8 = arith.subf %1, %7 : vector<4x256xf32>
    %9 = arith.mulf %8, %8 : vector<4x256xf32>
    %cst_5 = arith.constant dense<0.000000e+00> : vector<4xf32>
    %10 = vector.multi_reduction <add>, %9, %cst_5 [1] : vector<4x256xf32> to vector<4xf32>
    %11 = vector.shape_cast %10 : vector<4xf32> to vector<4x1xf32>
    %cst_6 = arith.constant 2.560000e+02 : f32
    %12 = vector.broadcast %cst_6 : f32 to vector<4x1xf32>
    %13 = arith.divf %11, %12 : vector<4x1xf32>
    %cst_7 = arith.constant 9.99999974E-6 : f32
    %14 = vector.broadcast %cst_7 : f32 to vector<4x1xf32>
    %15 = arith.addf %13, %14 : vector<4x1xf32>
    %16 = math.rsqrt %15 : vector<4x1xf32>
    %17 = vector.broadcast %16 : vector<4x1xf32> to vector<4x256xf32>
    %18 = arith.mulf %8, %17 : vector<4x256xf32>
    %c0_8 = arith.constant 0 : index
    %c0_9 = arith.constant 0 : index
    %19 = vector.load %arg4[%c0_8, %c0_9] : memref<12x4xf32, #tpu.memory_space<vmem>>, vector<12x4xf32>
    %cst_10 = arith.constant dense<0.000000e+00> : vector<12x256xf32>
    %20 = tpu.matmul %19, %18, %cst_10 {dimension_numbers = #tpu.dot_dimension_numbers<[1], [0], [0], [1], [0, 0, 1, 1], [], []>} : vector<12x4xf32>, vector<4x256xf32>, vector<12x256xf32> -> vector<12x256xf32>
    %c0_11 = arith.constant 0 : index
    %c0_12 = arith.constant 0 : index
    %21 = vector.load %arg5[%c0_11, %c0_12] : memref<12x1xf32, #tpu.memory_space<vmem>>, vector<12x1xf32>
    %22 = vector.broadcast %21 : vector<12x1xf32> to vector<12x256xf32>
    %23 = arith.addf %20, %22 : vector<12x256xf32>
    %c0_13 = arith.constant 0 : index
    %c0_14 = arith.constant 0 : index
    %24 = vector.load %arg6[%c0_13, %c0_14] : memref<12x9xf32, #tpu.memory_space<vmem>>, vector<12x9xf32>
    %c0_15 = arith.constant 0 : index
    %c0_16 = arith.constant 0 : index
    %25 = vector.load %arg7[%c0_15, %c0_16] : memref<12x1xf32, #tpu.memory_space<vmem>>, vector<12x1xf32>
    %26 = vector.extract_strided_slice %24 {offsets = [0, 4], sizes = [12, 1], strides = [1, 1]} : vector<12x9xf32> to vector<12x1xf32>
    %27 = vector.broadcast %26 : vector<12x1xf32> to vector<12x256xf32>
    %28 = arith.mulf %23, %27 : vector<12x256xf32>
    %29 = vector.broadcast %25 : vector<12x1xf32> to vector<12x256xf32>
    %30 = arith.addf %28, %29 : vector<12x256xf32>
    %c17_i32 = arith.constant 17 : i32
    %31 = tpu.dynamic_rotate %23 by %c17_i32 dim 1 : vector<12x256xf32>, i32 -> vector<12x256xf32>
    %32 = vector.extract_strided_slice %2 {offsets = [0, 0], sizes = [1, 256], strides = [1, 1]} : vector<9x256xf32> to vector<1x256xf32>
    %33 = vector.broadcast %32 : vector<1x256xf32> to vector<12x256xf32>
    %34 = arith.mulf %31, %33 : vector<12x256xf32>
    %35 = vector.extract_strided_slice %24 {offsets = [0, 0], sizes = [12, 1], strides = [1, 1]} : vector<12x9xf32> to vector<12x1xf32>
    %36 = vector.broadcast %35 : vector<12x1xf32> to vector<12x256xf32>
    %37 = arith.mulf %34, %36 : vector<12x256xf32>
    %38 = arith.addf %30, %37 : vector<12x256xf32>
    %c16_i32 = arith.constant 16 : i32
    %39 = tpu.dynamic_rotate %23 by %c16_i32 dim 1 : vector<12x256xf32>, i32 -> vector<12x256xf32>
    %40 = vector.extract_strided_slice %2 {offsets = [1, 0], sizes = [1, 256], strides = [1, 1]} : vector<9x256xf32> to vector<1x256xf32>
    %41 = vector.broadcast %40 : vector<1x256xf32> to vector<12x256xf32>
    %42 = arith.mulf %39, %41 : vector<12x256xf32>
    %43 = vector.extract_strided_slice %24 {offsets = [0, 1], sizes = [12, 1], strides = [1, 1]} : vector<12x9xf32> to vector<12x1xf32>
    %44 = vector.broadcast %43 : vector<12x1xf32> to vector<12x256xf32>
    %45 = arith.mulf %42, %44 : vector<12x256xf32>
    %46 = arith.addf %38, %45 : vector<12x256xf32>
    %c15_i32 = arith.constant 15 : i32
    %47 = tpu.dynamic_rotate %23 by %c15_i32 dim 1 : vector<12x256xf32>, i32 -> vector<12x256xf32>
    %48 = vector.extract_strided_slice %2 {offsets = [2, 0], sizes = [1, 256], strides = [1, 1]} : vector<9x256xf32> to vector<1x256xf32>
    %49 = vector.broadcast %48 : vector<1x256xf32> to vector<12x256xf32>
    %50 = arith.mulf %47, %49 : vector<12x256xf32>
    %51 = vector.extract_strided_slice %24 {offsets = [0, 2], sizes = [12, 1], strides = [1, 1]} : vector<12x9xf32> to vector<12x1xf32>
    %52 = vector.broadcast %51 : vector<12x1xf32> to vector<12x256xf32>
    %53 = arith.mulf %50, %52 : vector<12x256xf32>
    %54 = arith.addf %46, %53 : vector<12x256xf32>
    %c1_i32 = arith.constant 1 : i32
    %55 = tpu.dynamic_rotate %23 by %c1_i32 dim 1 : vector<12x256xf32>, i32 -> vector<12x256xf32>
    %56 = vector.extract_strided_slice %2 {offsets = [3, 0], sizes = [1, 256], strides = [1, 1]} : vector<9x256xf32> to vector<1x256xf32>
    %57 = vector.broadcast %56 : vector<1x256xf32> to vector<12x256xf32>
    %58 = arith.mulf %55, %57 : vector<12x256xf32>
    %59 = vector.extract_strided_slice %24 {offsets = [0, 3], sizes = [12, 1], strides = [1, 1]} : vector<12x9xf32> to vector<12x1xf32>
    %60 = vector.broadcast %59 : vector<12x1xf32> to vector<12x256xf32>
    %61 = arith.mulf %58, %60 : vector<12x256xf32>
    %62 = arith.addf %54, %61 : vector<12x256xf32>
    %c255_i32 = arith.constant 255 : i32
    %63 = tpu.dynamic_rotate %23 by %c255_i32 dim 1 : vector<12x256xf32>, i32 -> vector<12x256xf32>
    %64 = vector.extract_strided_slice %2 {offsets = [5, 0], sizes = [1, 256], strides = [1, 1]} : vector<9x256xf32> to vector<1x256xf32>
    %65 = vector.broadcast %64 : vector<1x256xf32> to vector<12x256xf32>
    %66 = arith.mulf %63, %65 : vector<12x256xf32>
    %67 = vector.extract_strided_slice %24 {offsets = [0, 5], sizes = [12, 1], strides = [1, 1]} : vector<12x9xf32> to vector<12x1xf32>
    %68 = vector.broadcast %67 : vector<12x1xf32> to vector<12x256xf32>
    %69 = arith.mulf %66, %68 : vector<12x256xf32>
    %70 = arith.addf %62, %69 : vector<12x256xf32>
    %c241_i32 = arith.constant 241 : i32
    %71 = tpu.dynamic_rotate %23 by %c241_i32 dim 1 : vector<12x256xf32>, i32 -> vector<12x256xf32>
    %72 = vector.extract_strided_slice %2 {offsets = [6, 0], sizes = [1, 256], strides = [1, 1]} : vector<9x256xf32> to vector<1x256xf32>
    %73 = vector.broadcast %72 : vector<1x256xf32> to vector<12x256xf32>
    %74 = arith.mulf %71, %73 : vector<12x256xf32>
    %75 = vector.extract_strided_slice %24 {offsets = [0, 6], sizes = [12, 1], strides = [1, 1]} : vector<12x9xf32> to vector<12x1xf32>
    %76 = vector.broadcast %75 : vector<12x1xf32> to vector<12x256xf32>
    %77 = arith.mulf %74, %76 : vector<12x256xf32>
    %78 = arith.addf %70, %77 : vector<12x256xf32>
    %c240_i32 = arith.constant 240 : i32
    %79 = tpu.dynamic_rotate %23 by %c240_i32 dim 1 : vector<12x256xf32>, i32 -> vector<12x256xf32>
    %80 = vector.extract_strided_slice %2 {offsets = [7, 0], sizes = [1, 256], strides = [1, 1]} : vector<9x256xf32> to vector<1x256xf32>
    %81 = vector.broadcast %80 : vector<1x256xf32> to vector<12x256xf32>
    %82 = arith.mulf %79, %81 : vector<12x256xf32>
    %83 = vector.extract_strided_slice %24 {offsets = [0, 7], sizes = [12, 1], strides = [1, 1]} : vector<12x9xf32> to vector<12x1xf32>
    %84 = vector.broadcast %83 : vector<12x1xf32> to vector<12x256xf32>
    %85 = arith.mulf %82, %84 : vector<12x256xf32>
    %86 = arith.addf %78, %85 : vector<12x256xf32>
    %c239_i32 = arith.constant 239 : i32
    %87 = tpu.dynamic_rotate %23 by %c239_i32 dim 1 : vector<12x256xf32>, i32 -> vector<12x256xf32>
    %88 = vector.extract_strided_slice %2 {offsets = [8, 0], sizes = [1, 256], strides = [1, 1]} : vector<9x256xf32> to vector<1x256xf32>
    %89 = vector.broadcast %88 : vector<1x256xf32> to vector<12x256xf32>
    %90 = arith.mulf %87, %89 : vector<12x256xf32>
    %91 = vector.extract_strided_slice %24 {offsets = [0, 8], sizes = [12, 1], strides = [1, 1]} : vector<12x9xf32> to vector<12x1xf32>
    %92 = vector.broadcast %91 : vector<12x1xf32> to vector<12x256xf32>
    %93 = arith.mulf %90, %92 : vector<12x256xf32>
    %94 = arith.addf %86, %93 : vector<12x256xf32>
    %c0_17 = arith.constant 0 : index
    %c0_18 = arith.constant 0 : index
    %95 = vector.load %arg8[%c0_17, %c0_18] : memref<4x4xf32, #tpu.memory_space<vmem>>, vector<4x4xf32>
    %96 = vector.extract_strided_slice %94 {offsets = [0, 0], sizes = [4, 256], strides = [1, 1]} : vector<12x256xf32> to vector<4x256xf32>
    %97 = vector.extract_strided_slice %94 {offsets = [4, 0], sizes = [4, 256], strides = [1, 1]} : vector<12x256xf32> to vector<4x256xf32>
    %98 = vector.extract_strided_slice %94 {offsets = [8, 0], sizes = [4, 256], strides = [1, 1]} : vector<12x256xf32> to vector<4x256xf32>
    %99 = arith.mulf %96, %96 : vector<4x256xf32>
    %cst_19 = arith.constant dense<0.000000e+00> : vector<4xf32>
    %100 = vector.multi_reduction <add>, %99, %cst_19 [1] : vector<4x256xf32> to vector<4xf32>
    %101 = vector.shape_cast %100 : vector<4xf32> to vector<4x1xf32>
    %102 = math.sqrt %101 : vector<4x1xf32>
    %cst_20 = arith.constant 9.99999996E-13 : f32
    %103 = vector.broadcast %cst_20 : f32 to vector<4x1xf32>
    %104 = arith.maximumf %102, %103 : vector<4x1xf32>
    %105 = vector.broadcast %104 : vector<4x1xf32> to vector<4x256xf32>
    %106 = arith.divf %96, %105 : vector<4x256xf32>
    %107 = arith.mulf %97, %97 : vector<4x256xf32>
    %cst_21 = arith.constant dense<0.000000e+00> : vector<4xf32>
    %108 = vector.multi_reduction <add>, %107, %cst_21 [1] : vector<4x256xf32> to vector<4xf32>
    %109 = vector.shape_cast %108 : vector<4xf32> to vector<4x1xf32>
    %110 = math.sqrt %109 : vector<4x1xf32>
    %cst_22 = arith.constant 9.99999996E-13 : f32
    %111 = vector.broadcast %cst_22 : f32 to vector<4x1xf32>
    %112 = arith.maximumf %110, %111 : vector<4x1xf32>
    %113 = vector.broadcast %112 : vector<4x1xf32> to vector<4x256xf32>
    %114 = arith.divf %97, %113 : vector<4x256xf32>
    %cst_23 = arith.constant dense<0.000000e+00> : vector<4x4xf32>
    %115 = tpu.matmul %106, %114, %cst_23 {dimension_numbers = #tpu.dot_dimension_numbers<[1], [1], [0], [0], [0, 0, 1, 0], [], []>} : vector<4x256xf32>, vector<4x256xf32>, vector<4x4xf32> -> vector<4x4xf32>
    %cst_24 = arith.constant 5.000000e-01 : f32
    %116 = vector.broadcast %cst_24 : f32 to vector<4x4xf32>
    %117 = arith.mulf %115, %116 : vector<4x4xf32>
    %cst_25 = arith.constant dense<0xFF800000> : vector<4xf32>
    %118 = vector.multi_reduction <maximumf>, %117, %cst_25 [1] : vector<4x4xf32> to vector<4xf32>
    %119 = vector.shape_cast %118 : vector<4xf32> to vector<4x1xf32>
    %120 = vector.broadcast %119 : vector<4x1xf32> to vector<4x4xf32>
    %121 = arith.subf %117, %120 : vector<4x4xf32>
    %122 = math.exp %121 : vector<4x4xf32>
    %cst_26 = arith.constant dense<0.000000e+00> : vector<4xf32>
    %123 = vector.multi_reduction <add>, %122, %cst_26 [1] : vector<4x4xf32> to vector<4xf32>
    %124 = vector.shape_cast %123 : vector<4xf32> to vector<4x1xf32>
    %125 = vector.broadcast %124 : vector<4x1xf32> to vector<4x4xf32>
    %126 = arith.divf %122, %125 : vector<4x4xf32>
    %cst_27 = arith.constant dense<0.000000e+00> : vector<4x256xf32>
    %127 = tpu.matmul %126, %98, %cst_27 {dimension_numbers = #tpu.dot_dimension_numbers<[1], [0], [0], [1], [0, 0, 1, 1], [], []>} : vector<4x4xf32>, vector<4x256xf32>, vector<4x256xf32> -> vector<4x256xf32>
    %cst_28 = arith.constant dense<0.000000e+00> : vector<4x256xf32>
    %128 = tpu.matmul %95, %127, %cst_28 {dimension_numbers = #tpu.dot_dimension_numbers<[1], [0], [0], [1], [0, 0, 1, 1], [], []>} : vector<4x4xf32>, vector<4x256xf32>, vector<4x256xf32> -> vector<4x256xf32>
    %c0_29 = arith.constant 0 : index
    %c0_30 = arith.constant 0 : index
    %129 = vector.load %arg11[%c0_29, %c0_30] : memref<4x9xf32, #tpu.memory_space<vmem>>, vector<4x9xf32>
    %c0_31 = arith.constant 0 : index
    %c0_32 = arith.constant 0 : index
    %130 = vector.load %arg12[%c0_31, %c0_32] : memref<4x1xf32, #tpu.memory_space<vmem>>, vector<4x1xf32>
    %131 = vector.extract_strided_slice %129 {offsets = [0, 4], sizes = [4, 1], strides = [1, 1]} : vector<4x9xf32> to vector<4x1xf32>
    %132 = vector.broadcast %131 : vector<4x1xf32> to vector<4x256xf32>
    %133 = arith.mulf %18, %132 : vector<4x256xf32>
    %134 = vector.broadcast %130 : vector<4x1xf32> to vector<4x256xf32>
    %135 = arith.addf %133, %134 : vector<4x256xf32>
    %c17_i32_33 = arith.constant 17 : i32
    %136 = tpu.dynamic_rotate %18 by %c17_i32_33 dim 1 : vector<4x256xf32>, i32 -> vector<4x256xf32>
    %137 = vector.extract_strided_slice %2 {offsets = [0, 0], sizes = [1, 256], strides = [1, 1]} : vector<9x256xf32> to vector<1x256xf32>
    %138 = vector.broadcast %137 : vector<1x256xf32> to vector<4x256xf32>
    %139 = arith.mulf %136, %138 : vector<4x256xf32>
    %140 = vector.extract_strided_slice %129 {offsets = [0, 0], sizes = [4, 1], strides = [1, 1]} : vector<4x9xf32> to vector<4x1xf32>
    %141 = vector.broadcast %140 : vector<4x1xf32> to vector<4x256xf32>
    %142 = arith.mulf %139, %141 : vector<4x256xf32>
    %143 = arith.addf %135, %142 : vector<4x256xf32>
    %c16_i32_34 = arith.constant 16 : i32
    %144 = tpu.dynamic_rotate %18 by %c16_i32_34 dim 1 : vector<4x256xf32>, i32 -> vector<4x256xf32>
    %145 = vector.extract_strided_slice %2 {offsets = [1, 0], sizes = [1, 256], strides = [1, 1]} : vector<9x256xf32> to vector<1x256xf32>
    %146 = vector.broadcast %145 : vector<1x256xf32> to vector<4x256xf32>
    %147 = arith.mulf %144, %146 : vector<4x256xf32>
    %148 = vector.extract_strided_slice %129 {offsets = [0, 1], sizes = [4, 1], strides = [1, 1]} : vector<4x9xf32> to vector<4x1xf32>
    %149 = vector.broadcast %148 : vector<4x1xf32> to vector<4x256xf32>
    %150 = arith.mulf %147, %149 : vector<4x256xf32>
    %151 = arith.addf %143, %150 : vector<4x256xf32>
    %c15_i32_35 = arith.constant 15 : i32
    %152 = tpu.dynamic_rotate %18 by %c15_i32_35 dim 1 : vector<4x256xf32>, i32 -> vector<4x256xf32>
    %153 = vector.extract_strided_slice %2 {offsets = [2, 0], sizes = [1, 256], strides = [1, 1]} : vector<9x256xf32> to vector<1x256xf32>
    %154 = vector.broadcast %153 : vector<1x256xf32> to vector<4x256xf32>
    %155 = arith.mulf %152, %154 : vector<4x256xf32>
    %156 = vector.extract_strided_slice %129 {offsets = [0, 2], sizes = [4, 1], strides = [1, 1]} : vector<4x9xf32> to vector<4x1xf32>
    %157 = vector.broadcast %156 : vector<4x1xf32> to vector<4x256xf32>
    %158 = arith.mulf %155, %157 : vector<4x256xf32>
    %159 = arith.addf %151, %158 : vector<4x256xf32>
    %c1_i32_36 = arith.constant 1 : i32
    %160 = tpu.dynamic_rotate %18 by %c1_i32_36 dim 1 : vector<4x256xf32>, i32 -> vector<4x256xf32>
    %161 = vector.extract_strided_slice %2 {offsets = [3, 0], sizes = [1, 256], strides = [1, 1]} : vector<9x256xf32> to vector<1x256xf32>
    %162 = vector.broadcast %161 : vector<1x256xf32> to vector<4x256xf32>
    %163 = arith.mulf %160, %162 : vector<4x256xf32>
    %164 = vector.extract_strided_slice %129 {offsets = [0, 3], sizes = [4, 1], strides = [1, 1]} : vector<4x9xf32> to vector<4x1xf32>
    %165 = vector.broadcast %164 : vector<4x1xf32> to vector<4x256xf32>
    %166 = arith.mulf %163, %165 : vector<4x256xf32>
    %167 = arith.addf %159, %166 : vector<4x256xf32>
    %c255_i32_37 = arith.constant 255 : i32
    %168 = tpu.dynamic_rotate %18 by %c255_i32_37 dim 1 : vector<4x256xf32>, i32 -> vector<4x256xf32>
    %169 = vector.extract_strided_slice %2 {offsets = [5, 0], sizes = [1, 256], strides = [1, 1]} : vector<9x256xf32> to vector<1x256xf32>
    %170 = vector.broadcast %169 : vector<1x256xf32> to vector<4x256xf32>
    %171 = arith.mulf %168, %170 : vector<4x256xf32>
    %172 = vector.extract_strided_slice %129 {offsets = [0, 5], sizes = [4, 1], strides = [1, 1]} : vector<4x9xf32> to vector<4x1xf32>
    %173 = vector.broadcast %172 : vector<4x1xf32> to vector<4x256xf32>
    %174 = arith.mulf %171, %173 : vector<4x256xf32>
    %175 = arith.addf %167, %174 : vector<4x256xf32>
    %c241_i32_38 = arith.constant 241 : i32
    %176 = tpu.dynamic_rotate %18 by %c241_i32_38 dim 1 : vector<4x256xf32>, i32 -> vector<4x256xf32>
    %177 = vector.extract_strided_slice %2 {offsets = [6, 0], sizes = [1, 256], strides = [1, 1]} : vector<9x256xf32> to vector<1x256xf32>
    %178 = vector.broadcast %177 : vector<1x256xf32> to vector<4x256xf32>
    %179 = arith.mulf %176, %178 : vector<4x256xf32>
    %180 = vector.extract_strided_slice %129 {offsets = [0, 6], sizes = [4, 1], strides = [1, 1]} : vector<4x9xf32> to vector<4x1xf32>
    %181 = vector.broadcast %180 : vector<4x1xf32> to vector<4x256xf32>
    %182 = arith.mulf %179, %181 : vector<4x256xf32>
    %183 = arith.addf %175, %182 : vector<4x256xf32>
    %c240_i32_39 = arith.constant 240 : i32
    %184 = tpu.dynamic_rotate %18 by %c240_i32_39 dim 1 : vector<4x256xf32>, i32 -> vector<4x256xf32>
    %185 = vector.extract_strided_slice %2 {offsets = [7, 0], sizes = [1, 256], strides = [1, 1]} : vector<9x256xf32> to vector<1x256xf32>
    %186 = vector.broadcast %185 : vector<1x256xf32> to vector<4x256xf32>
    %187 = arith.mulf %184, %186 : vector<4x256xf32>
    %188 = vector.extract_strided_slice %129 {offsets = [0, 7], sizes = [4, 1], strides = [1, 1]} : vector<4x9xf32> to vector<4x1xf32>
    %189 = vector.broadcast %188 : vector<4x1xf32> to vector<4x256xf32>
    %190 = arith.mulf %187, %189 : vector<4x256xf32>
    %191 = arith.addf %183, %190 : vector<4x256xf32>
    %c239_i32_40 = arith.constant 239 : i32
    %192 = tpu.dynamic_rotate %18 by %c239_i32_40 dim 1 : vector<4x256xf32>, i32 -> vector<4x256xf32>
    %193 = vector.extract_strided_slice %2 {offsets = [8, 0], sizes = [1, 256], strides = [1, 1]} : vector<9x256xf32> to vector<1x256xf32>
    %194 = vector.broadcast %193 : vector<1x256xf32> to vector<4x256xf32>
    %195 = arith.mulf %192, %194 : vector<4x256xf32>
    %196 = vector.extract_strided_slice %129 {offsets = [0, 8], sizes = [4, 1], strides = [1, 1]} : vector<4x9xf32> to vector<4x1xf32>
    %197 = vector.broadcast %196 : vector<4x1xf32> to vector<4x256xf32>
    %198 = arith.mulf %195, %197 : vector<4x256xf32>
    %199 = arith.addf %191, %198 : vector<4x256xf32>
    %cst_41 = arith.constant 0.000000e+00 : f32
    %200 = vector.broadcast %cst_41 : f32 to vector<4x256xf32>
    %201 = arith.cmpf oge, %199, %200 : vector<4x256xf32>
    %cst_42 = arith.constant 2.000000e-01 : f32
    %202 = vector.broadcast %cst_42 : f32 to vector<4x256xf32>
    %203 = arith.mulf %202, %199 : vector<4x256xf32>
    %204 = arith.select %201, %199, %203 : vector<4x256xi1>, vector<4x256xf32>
    %c0_43 = arith.constant 0 : index
    %c0_44 = arith.constant 0 : index
    %205 = vector.load %arg9[%c0_43, %c0_44] : memref<4x4xf32, #tpu.memory_space<vmem>>, vector<4x4xf32>
    %cst_45 = arith.constant dense<0.000000e+00> : vector<4x256xf32>
    %206 = tpu.matmul %205, %204, %cst_45 {dimension_numbers = #tpu.dot_dimension_numbers<[1], [0], [0], [1], [0, 0, 1, 1], [], []>} : vector<4x4xf32>, vector<4x256xf32>, vector<4x256xf32> -> vector<4x256xf32>
    %207 = arith.addf %128, %206 : vector<4x256xf32>
    %c0_46 = arith.constant 0 : index
    %c0_47 = arith.constant 0 : index
    %208 = vector.load %arg10[%c0_46, %c0_47] : memref<4x1xf32, #tpu.memory_space<vmem>>, vector<4x1xf32>
    %209 = vector.broadcast %208 : vector<4x1xf32> to vector<4x256xf32>
    %210 = arith.addf %207, %209 : vector<4x256xf32>
    %211 = arith.addf %1, %210 : vector<4x256xf32>
    %cst_48 = arith.constant dense<0.000000e+00> : vector<4xf32>
    %212 = vector.multi_reduction <add>, %211, %cst_48 [1] : vector<4x256xf32> to vector<4xf32>
    %213 = vector.shape_cast %212 : vector<4xf32> to vector<4x1xf32>
    %cst_49 = arith.constant 2.560000e+02 : f32
    %214 = vector.broadcast %cst_49 : f32 to vector<4x1xf32>
    %215 = arith.divf %213, %214 : vector<4x1xf32>
    %216 = vector.broadcast %215 : vector<4x1xf32> to vector<4x256xf32>
    %217 = arith.subf %211, %216 : vector<4x256xf32>
    %218 = arith.mulf %217, %217 : vector<4x256xf32>
    %cst_50 = arith.constant dense<0.000000e+00> : vector<4xf32>
    %219 = vector.multi_reduction <add>, %218, %cst_50 [1] : vector<4x256xf32> to vector<4xf32>
    %220 = vector.shape_cast %219 : vector<4xf32> to vector<4x1xf32>
    %cst_51 = arith.constant 2.560000e+02 : f32
    %221 = vector.broadcast %cst_51 : f32 to vector<4x1xf32>
    %222 = arith.divf %220, %221 : vector<4x1xf32>
    %cst_52 = arith.constant 9.99999974E-6 : f32
    %223 = vector.broadcast %cst_52 : f32 to vector<4x1xf32>
    %224 = arith.addf %222, %223 : vector<4x1xf32>
    %225 = math.rsqrt %224 : vector<4x1xf32>
    %226 = vector.broadcast %225 : vector<4x1xf32> to vector<4x256xf32>
    %227 = arith.mulf %217, %226 : vector<4x256xf32>
    %c0_53 = arith.constant 0 : index
    %c0_54 = arith.constant 0 : index
    %228 = vector.load %arg13[%c0_53, %c0_54] : memref<8x4xf32, #tpu.memory_space<vmem>>, vector<8x4xf32>
    %cst_55 = arith.constant dense<0.000000e+00> : vector<8x256xf32>
    %229 = tpu.matmul %228, %227, %cst_55 {dimension_numbers = #tpu.dot_dimension_numbers<[1], [0], [0], [1], [0, 0, 1, 1], [], []>} : vector<8x4xf32>, vector<4x256xf32>, vector<8x256xf32> -> vector<8x256xf32>
    %c0_56 = arith.constant 0 : index
    %c0_57 = arith.constant 0 : index
    %230 = vector.load %arg14[%c0_56, %c0_57] : memref<8x1xf32, #tpu.memory_space<vmem>>, vector<8x1xf32>
    %231 = vector.broadcast %230 : vector<8x1xf32> to vector<8x256xf32>
    %232 = arith.addf %229, %231 : vector<8x256xf32>
    %c0_58 = arith.constant 0 : index
    %c0_59 = arith.constant 0 : index
    %233 = vector.load %arg15[%c0_58, %c0_59] : memref<8x9xf32, #tpu.memory_space<vmem>>, vector<8x9xf32>
    %c0_60 = arith.constant 0 : index
    %c0_61 = arith.constant 0 : index
    %234 = vector.load %arg16[%c0_60, %c0_61] : memref<8x1xf32, #tpu.memory_space<vmem>>, vector<8x1xf32>
    %235 = vector.extract_strided_slice %233 {offsets = [0, 4], sizes = [8, 1], strides = [1, 1]} : vector<8x9xf32> to vector<8x1xf32>
    %236 = vector.broadcast %235 : vector<8x1xf32> to vector<8x256xf32>
    %237 = arith.mulf %232, %236 : vector<8x256xf32>
    %238 = vector.broadcast %234 : vector<8x1xf32> to vector<8x256xf32>
    %239 = arith.addf %237, %238 : vector<8x256xf32>
    %c17_i32_62 = arith.constant 17 : i32
    %240 = tpu.dynamic_rotate %232 by %c17_i32_62 dim 1 : vector<8x256xf32>, i32 -> vector<8x256xf32>
    %241 = vector.extract_strided_slice %2 {offsets = [0, 0], sizes = [1, 256], strides = [1, 1]} : vector<9x256xf32> to vector<1x256xf32>
    %242 = vector.broadcast %241 : vector<1x256xf32> to vector<8x256xf32>
    %243 = arith.mulf %240, %242 : vector<8x256xf32>
    %244 = vector.extract_strided_slice %233 {offsets = [0, 0], sizes = [8, 1], strides = [1, 1]} : vector<8x9xf32> to vector<8x1xf32>
    %245 = vector.broadcast %244 : vector<8x1xf32> to vector<8x256xf32>
    %246 = arith.mulf %243, %245 : vector<8x256xf32>
    %247 = arith.addf %239, %246 : vector<8x256xf32>
    %c16_i32_63 = arith.constant 16 : i32
    %248 = tpu.dynamic_rotate %232 by %c16_i32_63 dim 1 : vector<8x256xf32>, i32 -> vector<8x256xf32>
    %249 = vector.extract_strided_slice %2 {offsets = [1, 0], sizes = [1, 256], strides = [1, 1]} : vector<9x256xf32> to vector<1x256xf32>
    %250 = vector.broadcast %249 : vector<1x256xf32> to vector<8x256xf32>
    %251 = arith.mulf %248, %250 : vector<8x256xf32>
    %252 = vector.extract_strided_slice %233 {offsets = [0, 1], sizes = [8, 1], strides = [1, 1]} : vector<8x9xf32> to vector<8x1xf32>
    %253 = vector.broadcast %252 : vector<8x1xf32> to vector<8x256xf32>
    %254 = arith.mulf %251, %253 : vector<8x256xf32>
    %255 = arith.addf %247, %254 : vector<8x256xf32>
    %c15_i32_64 = arith.constant 15 : i32
    %256 = tpu.dynamic_rotate %232 by %c15_i32_64 dim 1 : vector<8x256xf32>, i32 -> vector<8x256xf32>
    %257 = vector.extract_strided_slice %2 {offsets = [2, 0], sizes = [1, 256], strides = [1, 1]} : vector<9x256xf32> to vector<1x256xf32>
    %258 = vector.broadcast %257 : vector<1x256xf32> to vector<8x256xf32>
    %259 = arith.mulf %256, %258 : vector<8x256xf32>
    %260 = vector.extract_strided_slice %233 {offsets = [0, 2], sizes = [8, 1], strides = [1, 1]} : vector<8x9xf32> to vector<8x1xf32>
    %261 = vector.broadcast %260 : vector<8x1xf32> to vector<8x256xf32>
    %262 = arith.mulf %259, %261 : vector<8x256xf32>
    %263 = arith.addf %255, %262 : vector<8x256xf32>
    %c1_i32_65 = arith.constant 1 : i32
    %264 = tpu.dynamic_rotate %232 by %c1_i32_65 dim 1 : vector<8x256xf32>, i32 -> vector<8x256xf32>
    %265 = vector.extract_strided_slice %2 {offsets = [3, 0], sizes = [1, 256], strides = [1, 1]} : vector<9x256xf32> to vector<1x256xf32>
    %266 = vector.broadcast %265 : vector<1x256xf32> to vector<8x256xf32>
    %267 = arith.mulf %264, %266 : vector<8x256xf32>
    %268 = vector.extract_strided_slice %233 {offsets = [0, 3], sizes = [8, 1], strides = [1, 1]} : vector<8x9xf32> to vector<8x1xf32>
    %269 = vector.broadcast %268 : vector<8x1xf32> to vector<8x256xf32>
    %270 = arith.mulf %267, %269 : vector<8x256xf32>
    %271 = arith.addf %263, %270 : vector<8x256xf32>
    %c255_i32_66 = arith.constant 255 : i32
    %272 = tpu.dynamic_rotate %232 by %c255_i32_66 dim 1 : vector<8x256xf32>, i32 -> vector<8x256xf32>
    %273 = vector.extract_strided_slice %2 {offsets = [5, 0], sizes = [1, 256], strides = [1, 1]} : vector<9x256xf32> to vector<1x256xf32>
    %274 = vector.broadcast %273 : vector<1x256xf32> to vector<8x256xf32>
    %275 = arith.mulf %272, %274 : vector<8x256xf32>
    %276 = vector.extract_strided_slice %233 {offsets = [0, 5], sizes = [8, 1], strides = [1, 1]} : vector<8x9xf32> to vector<8x1xf32>
    %277 = vector.broadcast %276 : vector<8x1xf32> to vector<8x256xf32>
    %278 = arith.mulf %275, %277 : vector<8x256xf32>
    %279 = arith.addf %271, %278 : vector<8x256xf32>
    %c241_i32_67 = arith.constant 241 : i32
    %280 = tpu.dynamic_rotate %232 by %c241_i32_67 dim 1 : vector<8x256xf32>, i32 -> vector<8x256xf32>
    %281 = vector.extract_strided_slice %2 {offsets = [6, 0], sizes = [1, 256], strides = [1, 1]} : vector<9x256xf32> to vector<1x256xf32>
    %282 = vector.broadcast %281 : vector<1x256xf32> to vector<8x256xf32>
    %283 = arith.mulf %280, %282 : vector<8x256xf32>
    %284 = vector.extract_strided_slice %233 {offsets = [0, 6], sizes = [8, 1], strides = [1, 1]} : vector<8x9xf32> to vector<8x1xf32>
    %285 = vector.broadcast %284 : vector<8x1xf32> to vector<8x256xf32>
    %286 = arith.mulf %283, %285 : vector<8x256xf32>
    %287 = arith.addf %279, %286 : vector<8x256xf32>
    %c240_i32_68 = arith.constant 240 : i32
    %288 = tpu.dynamic_rotate %232 by %c240_i32_68 dim 1 : vector<8x256xf32>, i32 -> vector<8x256xf32>
    %289 = vector.extract_strided_slice %2 {offsets = [7, 0], sizes = [1, 256], strides = [1, 1]} : vector<9x256xf32> to vector<1x256xf32>
    %290 = vector.broadcast %289 : vector<1x256xf32> to vector<8x256xf32>
    %291 = arith.mulf %288, %290 : vector<8x256xf32>
    %292 = vector.extract_strided_slice %233 {offsets = [0, 7], sizes = [8, 1], strides = [1, 1]} : vector<8x9xf32> to vector<8x1xf32>
    %293 = vector.broadcast %292 : vector<8x1xf32> to vector<8x256xf32>
    %294 = arith.mulf %291, %293 : vector<8x256xf32>
    %295 = arith.addf %287, %294 : vector<8x256xf32>
    %c239_i32_69 = arith.constant 239 : i32
    %296 = tpu.dynamic_rotate %232 by %c239_i32_69 dim 1 : vector<8x256xf32>, i32 -> vector<8x256xf32>
    %297 = vector.extract_strided_slice %2 {offsets = [8, 0], sizes = [1, 256], strides = [1, 1]} : vector<9x256xf32> to vector<1x256xf32>
    %298 = vector.broadcast %297 : vector<1x256xf32> to vector<8x256xf32>
    %299 = arith.mulf %296, %298 : vector<8x256xf32>
    %300 = vector.extract_strided_slice %233 {offsets = [0, 8], sizes = [8, 1], strides = [1, 1]} : vector<8x9xf32> to vector<8x1xf32>
    %301 = vector.broadcast %300 : vector<8x1xf32> to vector<8x256xf32>
    %302 = arith.mulf %299, %301 : vector<8x256xf32>
    %303 = arith.addf %295, %302 : vector<8x256xf32>
    %304 = arith.mulf %303, %303 : vector<8x256xf32>
    %305 = arith.mulf %303, %304 : vector<8x256xf32>
    %cst_70 = arith.constant 4.471500e-02 : f32
    %306 = vector.broadcast %cst_70 : f32 to vector<8x256xf32>
    %307 = arith.mulf %306, %305 : vector<8x256xf32>
    %308 = arith.addf %303, %307 : vector<8x256xf32>
    %cst_71 = arith.constant 0.797884583 : f32
    %309 = vector.broadcast %cst_71 : f32 to vector<8x256xf32>
    %310 = arith.mulf %309, %308 : vector<8x256xf32>
    %311 = math.tanh %310 : vector<8x256xf32>
    %cst_72 = arith.constant 1.000000e+00 : f32
    %312 = vector.broadcast %cst_72 : f32 to vector<8x256xf32>
    %313 = arith.addf %312, %311 : vector<8x256xf32>
    %cst_73 = arith.constant 5.000000e-01 : f32
    %314 = vector.broadcast %cst_73 : f32 to vector<8x256xf32>
    %315 = arith.mulf %314, %313 : vector<8x256xf32>
    %316 = arith.mulf %303, %315 : vector<8x256xf32>
    %c0_74 = arith.constant 0 : index
    %c0_75 = arith.constant 0 : index
    %317 = vector.load %arg17[%c0_74, %c0_75] : memref<4x8xf32, #tpu.memory_space<vmem>>, vector<4x8xf32>
    %cst_76 = arith.constant dense<0.000000e+00> : vector<4x256xf32>
    %318 = tpu.matmul %317, %316, %cst_76 {dimension_numbers = #tpu.dot_dimension_numbers<[1], [0], [0], [1], [0, 0, 1, 1], [], []>} : vector<4x8xf32>, vector<8x256xf32>, vector<4x256xf32> -> vector<4x256xf32>
    %c0_77 = arith.constant 0 : index
    %c0_78 = arith.constant 0 : index
    %319 = vector.load %arg18[%c0_77, %c0_78] : memref<4x1xf32, #tpu.memory_space<vmem>>, vector<4x1xf32>
    %320 = vector.broadcast %319 : vector<4x1xf32> to vector<4x256xf32>
    %321 = arith.addf %318, %320 : vector<4x256xf32>
    %322 = arith.addf %211, %321 : vector<4x256xf32>
    %c0_79 = arith.constant 0 : index
    %c0_80 = arith.constant 0 : index
    %c0_81 = arith.constant 0 : index
    %323 = vector.load %arg19[%c0_79, %c0_80, %c0_81] : memref<9x8x4xf32, #tpu.memory_space<vmem>>, vector<9x8x4xf32>
    %324 = vector.extract_strided_slice %323 {offsets = [4, 0, 0], sizes = [1, 8, 4], strides = [1, 1, 1]} : vector<9x8x4xf32> to vector<1x8x4xf32>
    %325 = vector.shape_cast %324 : vector<1x8x4xf32> to vector<8x4xf32>
    %cst_82 = arith.constant dense<0.000000e+00> : vector<8x256xf32>
    %326 = tpu.matmul %325, %322, %cst_82 {dimension_numbers = #tpu.dot_dimension_numbers<[1], [0], [0], [1], [0, 0, 1, 1], [], []>} : vector<8x4xf32>, vector<4x256xf32>, vector<8x256xf32> -> vector<8x256xf32>
    %c0_83 = arith.constant 0 : index
    %c0_84 = arith.constant 0 : index
    %327 = vector.load %arg20[%c0_83, %c0_84] : memref<8x1xf32, #tpu.memory_space<vmem>>, vector<8x1xf32>
    %328 = vector.broadcast %327 : vector<8x1xf32> to vector<8x256xf32>
    %329 = arith.addf %326, %328 : vector<8x256xf32>
    %330 = vector.extract_strided_slice %323 {offsets = [0, 0, 0], sizes = [1, 8, 4], strides = [1, 1, 1]} : vector<9x8x4xf32> to vector<1x8x4xf32>
    %331 = vector.shape_cast %330 : vector<1x8x4xf32> to vector<8x4xf32>
    %c17_i32_85 = arith.constant 17 : i32
    %332 = tpu.dynamic_rotate %322 by %c17_i32_85 dim 1 : vector<4x256xf32>, i32 -> vector<4x256xf32>
    %333 = vector.extract_strided_slice %2 {offsets = [0, 0], sizes = [1, 256], strides = [1, 1]} : vector<9x256xf32> to vector<1x256xf32>
    %334 = vector.broadcast %333 : vector<1x256xf32> to vector<4x256xf32>
    %335 = arith.mulf %332, %334 : vector<4x256xf32>
    %cst_86 = arith.constant dense<0.000000e+00> : vector<8x256xf32>
    %336 = tpu.matmul %331, %335, %cst_86 {dimension_numbers = #tpu.dot_dimension_numbers<[1], [0], [0], [1], [0, 0, 1, 1], [], []>} : vector<8x4xf32>, vector<4x256xf32>, vector<8x256xf32> -> vector<8x256xf32>
    %337 = arith.addf %329, %336 : vector<8x256xf32>
    %338 = vector.extract_strided_slice %323 {offsets = [1, 0, 0], sizes = [1, 8, 4], strides = [1, 1, 1]} : vector<9x8x4xf32> to vector<1x8x4xf32>
    %339 = vector.shape_cast %338 : vector<1x8x4xf32> to vector<8x4xf32>
    %c16_i32_87 = arith.constant 16 : i32
    %340 = tpu.dynamic_rotate %322 by %c16_i32_87 dim 1 : vector<4x256xf32>, i32 -> vector<4x256xf32>
    %341 = vector.extract_strided_slice %2 {offsets = [1, 0], sizes = [1, 256], strides = [1, 1]} : vector<9x256xf32> to vector<1x256xf32>
    %342 = vector.broadcast %341 : vector<1x256xf32> to vector<4x256xf32>
    %343 = arith.mulf %340, %342 : vector<4x256xf32>
    %cst_88 = arith.constant dense<0.000000e+00> : vector<8x256xf32>
    %344 = tpu.matmul %339, %343, %cst_88 {dimension_numbers = #tpu.dot_dimension_numbers<[1], [0], [0], [1], [0, 0, 1, 1], [], []>} : vector<8x4xf32>, vector<4x256xf32>, vector<8x256xf32> -> vector<8x256xf32>
    %345 = arith.addf %337, %344 : vector<8x256xf32>
    %346 = vector.extract_strided_slice %323 {offsets = [2, 0, 0], sizes = [1, 8, 4], strides = [1, 1, 1]} : vector<9x8x4xf32> to vector<1x8x4xf32>
    %347 = vector.shape_cast %346 : vector<1x8x4xf32> to vector<8x4xf32>
    %c15_i32_89 = arith.constant 15 : i32
    %348 = tpu.dynamic_rotate %322 by %c15_i32_89 dim 1 : vector<4x256xf32>, i32 -> vector<4x256xf32>
    %349 = vector.extract_strided_slice %2 {offsets = [2, 0], sizes = [1, 256], strides = [1, 1]} : vector<9x256xf32> to vector<1x256xf32>
    %350 = vector.broadcast %349 : vector<1x256xf32> to vector<4x256xf32>
    %351 = arith.mulf %348, %350 : vector<4x256xf32>
    %cst_90 = arith.constant dense<0.000000e+00> : vector<8x256xf32>
    %352 = tpu.matmul %347, %351, %cst_90 {dimension_numbers = #tpu.dot_dimension_numbers<[1], [0], [0], [1], [0, 0, 1, 1], [], []>} : vector<8x4xf32>, vector<4x256xf32>, vector<8x256xf32> -> vector<8x256xf32>
    %353 = arith.addf %345, %352 : vector<8x256xf32>
    %354 = vector.extract_strided_slice %323 {offsets = [3, 0, 0], sizes = [1, 8, 4], strides = [1, 1, 1]} : vector<9x8x4xf32> to vector<1x8x4xf32>
    %355 = vector.shape_cast %354 : vector<1x8x4xf32> to vector<8x4xf32>
    %c1_i32_91 = arith.constant 1 : i32
    %356 = tpu.dynamic_rotate %322 by %c1_i32_91 dim 1 : vector<4x256xf32>, i32 -> vector<4x256xf32>
    %357 = vector.extract_strided_slice %2 {offsets = [3, 0], sizes = [1, 256], strides = [1, 1]} : vector<9x256xf32> to vector<1x256xf32>
    %358 = vector.broadcast %357 : vector<1x256xf32> to vector<4x256xf32>
    %359 = arith.mulf %356, %358 : vector<4x256xf32>
    %cst_92 = arith.constant dense<0.000000e+00> : vector<8x256xf32>
    %360 = tpu.matmul %355, %359, %cst_92 {dimension_numbers = #tpu.dot_dimension_numbers<[1], [0], [0], [1], [0, 0, 1, 1], [], []>} : vector<8x4xf32>, vector<4x256xf32>, vector<8x256xf32> -> vector<8x256xf32>
    %361 = arith.addf %353, %360 : vector<8x256xf32>
    %362 = vector.extract_strided_slice %323 {offsets = [5, 0, 0], sizes = [1, 8, 4], strides = [1, 1, 1]} : vector<9x8x4xf32> to vector<1x8x4xf32>
    %363 = vector.shape_cast %362 : vector<1x8x4xf32> to vector<8x4xf32>
    %c255_i32_93 = arith.constant 255 : i32
    %364 = tpu.dynamic_rotate %322 by %c255_i32_93 dim 1 : vector<4x256xf32>, i32 -> vector<4x256xf32>
    %365 = vector.extract_strided_slice %2 {offsets = [5, 0], sizes = [1, 256], strides = [1, 1]} : vector<9x256xf32> to vector<1x256xf32>
    %366 = vector.broadcast %365 : vector<1x256xf32> to vector<4x256xf32>
    %367 = arith.mulf %364, %366 : vector<4x256xf32>
    %cst_94 = arith.constant dense<0.000000e+00> : vector<8x256xf32>
    %368 = tpu.matmul %363, %367, %cst_94 {dimension_numbers = #tpu.dot_dimension_numbers<[1], [0], [0], [1], [0, 0, 1, 1], [], []>} : vector<8x4xf32>, vector<4x256xf32>, vector<8x256xf32> -> vector<8x256xf32>
    %369 = arith.addf %361, %368 : vector<8x256xf32>
    %370 = vector.extract_strided_slice %323 {offsets = [6, 0, 0], sizes = [1, 8, 4], strides = [1, 1, 1]} : vector<9x8x4xf32> to vector<1x8x4xf32>
    %371 = vector.shape_cast %370 : vector<1x8x4xf32> to vector<8x4xf32>
    %c241_i32_95 = arith.constant 241 : i32
    %372 = tpu.dynamic_rotate %322 by %c241_i32_95 dim 1 : vector<4x256xf32>, i32 -> vector<4x256xf32>
    %373 = vector.extract_strided_slice %2 {offsets = [6, 0], sizes = [1, 256], strides = [1, 1]} : vector<9x256xf32> to vector<1x256xf32>
    %374 = vector.broadcast %373 : vector<1x256xf32> to vector<4x256xf32>
    %375 = arith.mulf %372, %374 : vector<4x256xf32>
    %cst_96 = arith.constant dense<0.000000e+00> : vector<8x256xf32>
    %376 = tpu.matmul %371, %375, %cst_96 {dimension_numbers = #tpu.dot_dimension_numbers<[1], [0], [0], [1], [0, 0, 1, 1], [], []>} : vector<8x4xf32>, vector<4x256xf32>, vector<8x256xf32> -> vector<8x256xf32>
    %377 = arith.addf %369, %376 : vector<8x256xf32>
    %378 = vector.extract_strided_slice %323 {offsets = [7, 0, 0], sizes = [1, 8, 4], strides = [1, 1, 1]} : vector<9x8x4xf32> to vector<1x8x4xf32>
    %379 = vector.shape_cast %378 : vector<1x8x4xf32> to vector<8x4xf32>
    %c240_i32_97 = arith.constant 240 : i32
    %380 = tpu.dynamic_rotate %322 by %c240_i32_97 dim 1 : vector<4x256xf32>, i32 -> vector<4x256xf32>
    %381 = vector.extract_strided_slice %2 {offsets = [7, 0], sizes = [1, 256], strides = [1, 1]} : vector<9x256xf32> to vector<1x256xf32>
    %382 = vector.broadcast %381 : vector<1x256xf32> to vector<4x256xf32>
    %383 = arith.mulf %380, %382 : vector<4x256xf32>
    %cst_98 = arith.constant dense<0.000000e+00> : vector<8x256xf32>
    %384 = tpu.matmul %379, %383, %cst_98 {dimension_numbers = #tpu.dot_dimension_numbers<[1], [0], [0], [1], [0, 0, 1, 1], [], []>} : vector<8x4xf32>, vector<4x256xf32>, vector<8x256xf32> -> vector<8x256xf32>
    %385 = arith.addf %377, %384 : vector<8x256xf32>
    %386 = vector.extract_strided_slice %323 {offsets = [8, 0, 0], sizes = [1, 8, 4], strides = [1, 1, 1]} : vector<9x8x4xf32> to vector<1x8x4xf32>
    %387 = vector.shape_cast %386 : vector<1x8x4xf32> to vector<8x4xf32>
    %c239_i32_99 = arith.constant 239 : i32
    %388 = tpu.dynamic_rotate %322 by %c239_i32_99 dim 1 : vector<4x256xf32>, i32 -> vector<4x256xf32>
    %389 = vector.extract_strided_slice %2 {offsets = [8, 0], sizes = [1, 256], strides = [1, 1]} : vector<9x256xf32> to vector<1x256xf32>
    %390 = vector.broadcast %389 : vector<1x256xf32> to vector<4x256xf32>
    %391 = arith.mulf %388, %390 : vector<4x256xf32>
    %cst_100 = arith.constant dense<0.000000e+00> : vector<8x256xf32>
    %392 = tpu.matmul %387, %391, %cst_100 {dimension_numbers = #tpu.dot_dimension_numbers<[1], [0], [0], [1], [0, 0, 1, 1], [], []>} : vector<8x4xf32>, vector<4x256xf32>, vector<8x256xf32> -> vector<8x256xf32>
    %393 = arith.addf %385, %392 : vector<8x256xf32>
    %cst_101 = arith.constant 0.000000e+00 : f32
    %394 = vector.broadcast %cst_101 : f32 to vector<8x256xf32>
    %395 = arith.cmpf oge, %393, %394 : vector<8x256xf32>
    %cst_102 = arith.constant 2.000000e-01 : f32
    %396 = vector.broadcast %cst_102 : f32 to vector<8x256xf32>
    %397 = arith.mulf %396, %393 : vector<8x256xf32>
    %398 = arith.select %395, %393, %397 : vector<8x256xi1>, vector<8x256xf32>
    %c0_103 = arith.constant 0 : index
    %c0_104 = arith.constant 0 : index
    %c0_105 = arith.constant 0 : index
    %399 = vector.load %arg21[%c0_103, %c0_104, %c0_105] : memref<1x8x256xf32, #tpu.memory_space<vmem>>, vector<1x8x256xf32>
    %400 = vector.shape_cast %399 : vector<1x8x256xf32> to vector<8x256xf32>
    %401 = vector.shape_cast %398 : vector<8x256xf32> to vector<1x8x256xf32>
    tpu.vector_store %arg21[%c0_103, %c0_104, %c0_105], %401 {strides = array<i32>} : memref<1x8x256xf32, #tpu.memory_space<vmem>>, vector<1x8x256xf32>,
    %c255_i32_106 = arith.constant 255 : i32
    %402 = tpu.dynamic_rotate %398 by %c255_i32_106 dim 1 : vector<8x256xf32>, i32 -> vector<8x256xf32>
    %403 = arith.maximumf %398, %402 : vector<8x256xf32>
    %c240_i32_107 = arith.constant 240 : i32
    %404 = tpu.dynamic_rotate %403 by %c240_i32_107 dim 1 : vector<8x256xf32>, i32 -> vector<8x256xf32>
    %405 = arith.maximumf %403, %404 : vector<8x256xf32>
    %c0_108 = arith.constant 0 : index
    %c0_109 = arith.constant 0 : index
    %406 = vector.load %arg3[%c0_108, %c0_109] : memref<256x64xf32, #tpu.memory_space<vmem>>, vector<256x64xf32>
    %cst_110 = arith.constant dense<0.000000e+00> : vector<8x64xf32>
    %407 = tpu.matmul %405, %406, %cst_110 {dimension_numbers = #tpu.dot_dimension_numbers<[1], [0], [0], [1], [0, 0, 1, 1], [], []>} : vector<8x256xf32>, vector<256x64xf32>, vector<8x64xf32> -> vector<8x64xf32>
    %c0_111 = arith.constant 0 : index
    %c0_112 = arith.constant 0 : index
    %c0_113 = arith.constant 0 : index
    %408 = vector.load %arg22[%c0_111, %c0_112, %c0_113] : memref<1x8x64xf32, #tpu.memory_space<vmem>>, vector<1x8x64xf32>
    %409 = vector.shape_cast %408 : vector<1x8x64xf32> to vector<8x64xf32>
    %410 = vector.shape_cast %407 : vector<8x64xf32> to vector<1x8x64xf32>
    tpu.vector_store %arg22[%c0_111, %c0_112, %c0_113], %410 {strides = array<i32>} : memref<1x8x64xf32, #tpu.memory_space<vmem>>, vector<1x8x64xf32>,
    return
  }
  func.func @transform_0(%arg0: i32) -> (i32, i32, i32) {
    %c0_i32 = arith.constant 0 : i32
    %c0_i32_0 = arith.constant 0 : i32
    %c0_i32_1 = arith.constant 0 : i32
    return %arg0, %c0_i32, %c0_i32_0 : i32, i32, i32
  }
  func.func @transform_1(%arg0: i32) -> (i32, i32) {
    %c0_i32 = arith.constant 0 : i32
    %c0_i32_0 = arith.constant 0 : i32
    %c0_i32_1 = arith.constant 0 : i32
    return %c0_i32, %c0_i32_0 : i32, i32
  }
  func.func @transform_2(%arg0: i32) -> (i32, i32) {
    %c0_i32 = arith.constant 0 : i32
    %c0_i32_0 = arith.constant 0 : i32
    %c0_i32_1 = arith.constant 0 : i32
    return %c0_i32, %c0_i32_0 : i32, i32
  }
  func.func @transform_3(%arg0: i32) -> (i32, i32) {
    %c0_i32 = arith.constant 0 : i32
    %c0_i32_0 = arith.constant 0 : i32
    %c0_i32_1 = arith.constant 0 : i32
    return %c0_i32, %c0_i32_0 : i32, i32
  }
  func.func @transform_4(%arg0: i32) -> (i32, i32) {
    %c0_i32 = arith.constant 0 : i32
    %c0_i32_0 = arith.constant 0 : i32
    %c0_i32_1 = arith.constant 0 : i32
    return %c0_i32, %c0_i32_0 : i32, i32
  }
  func.func @transform_5(%arg0: i32) -> (i32, i32) {
    %c0_i32 = arith.constant 0 : i32
    %c0_i32_0 = arith.constant 0 : i32
    %c0_i32_1 = arith.constant 0 : i32
    return %c0_i32, %c0_i32_0 : i32, i32
  }
  func.func @transform_6(%arg0: i32) -> (i32, i32) {
    %c0_i32 = arith.constant 0 : i32
    %c0_i32_0 = arith.constant 0 : i32
    %c0_i32_1 = arith.constant 0 : i32
    return %c0_i32, %c0_i32_0 : i32, i32
  }
  func.func @transform_7(%arg0: i32) -> (i32, i32) {
    %c0_i32 = arith.constant 0 : i32
    %c0_i32_0 = arith.constant 0 : i32
    %c0_i32_1 = arith.constant 0 : i32
    return %c0_i32, %c0_i32_0 : i32, i32
  }
  func.func @transform_8(%arg0: i32) -> (i32, i32) {
    %c0_i32 = arith.constant 0 : i32
    %c0_i32_0 = arith.constant 0 : i32
    %c0_i32_1 = arith.constant 0 : i32
    return %c0_i32, %c0_i32_0 : i32, i32
  }
  func.func @transform_9(%arg0: i32) -> (i32, i32) {
    %c0_i32 = arith.constant 0 : i32
    %c0_i32_0 = arith.constant 0 : i32
    %c0_i32_1 = arith.constant 0 : i32
    return %c0_i32, %c0_i32_0 : i32, i32
  }
  func.func @transform_10(%arg0: i32) -> (i32, i32) {
    %c0_i32 = arith.constant 0 : i32
    %c0_i32_0 = arith.constant 0 : i32
    %c0_i32_1 = arith.constant 0 : i32
    return %c0_i32, %c0_i32_0 : i32, i32
  }
  func.func @transform_11(%arg0: i32) -> (i32, i32) {
    %c0_i32 = arith.constant 0 : i32
    %c0_i32_0 = arith.constant 0 : i32
    %c0_i32_1 = arith.constant 0 : i32
    return %c0_i32, %c0_i32_0 : i32, i32
  }
  func.func @transform_12(%arg0: i32) -> (i32, i32) {
    %c0_i32 = arith.constant 0 : i32
    %c0_i32_0 = arith.constant 0 : i32
    %c0_i32_1 = arith.constant 0 : i32
    return %c0_i32, %c0_i32_0 : i32, i32
  }
  func.func @transform_13(%arg0: i32) -> (i32, i32) {
    %c0_i32 = arith.constant 0 : i32
    %c0_i32_0 = arith.constant 0 : i32
    %c0_i32_1 = arith.constant 0 : i32
    return %c0_i32, %c0_i32_0 : i32, i32
  }
  func.func @transform_14(%arg0: i32) -> (i32, i32) {
    %c0_i32 = arith.constant 0 : i32
    %c0_i32_0 = arith.constant 0 : i32
    %c0_i32_1 = arith.constant 0 : i32
    return %c0_i32, %c0_i32_0 : i32, i32
  }
  func.func @transform_15(%arg0: i32) -> (i32, i32) {
    %c0_i32 = arith.constant 0 : i32
    %c0_i32_0 = arith.constant 0 : i32
    %c0_i32_1 = arith.constant 0 : i32
    return %c0_i32, %c0_i32_0 : i32, i32
  }
  func.func @transform_16(%arg0: i32) -> (i32, i32) {
    %c0_i32 = arith.constant 0 : i32
    %c0_i32_0 = arith.constant 0 : i32
    %c0_i32_1 = arith.constant 0 : i32
    return %c0_i32, %c0_i32_0 : i32, i32
  }
  func.func @transform_17(%arg0: i32) -> (i32, i32) {
    %c0_i32 = arith.constant 0 : i32
    %c0_i32_0 = arith.constant 0 : i32
    %c0_i32_1 = arith.constant 0 : i32
    return %c0_i32, %c0_i32_0 : i32, i32
  }
  func.func @transform_18(%arg0: i32) -> (i32, i32, i32) {
    %c0_i32 = arith.constant 0 : i32
    %c0_i32_0 = arith.constant 0 : i32
    %c0_i32_1 = arith.constant 0 : i32
    %c0_i32_2 = arith.constant 0 : i32
    return %c0_i32, %c0_i32_0, %c0_i32_1 : i32, i32, i32
  }
  func.func @transform_19(%arg0: i32) -> (i32, i32) {
    %c0_i32 = arith.constant 0 : i32
    %c0_i32_0 = arith.constant 0 : i32
    %c0_i32_1 = arith.constant 0 : i32
    return %c0_i32, %c0_i32_0 : i32, i32
  }
  func.func @transform_20(%arg0: i32) -> (i32, i32, i32) {
    %c0_i32 = arith.constant 0 : i32
    %c0_i32_0 = arith.constant 0 : i32
    %c0_i32_1 = arith.constant 0 : i32
    return %arg0, %c0_i32, %c0_i32_0 : i32, i32, i32
  }
  func.func @transform_21(%arg0: i32) -> (i32, i32, i32) {
    %c0_i32 = arith.constant 0 : i32
    %c0_i32_0 = arith.constant 0 : i32
    %c0_i32_1 = arith.constant 0 : i32
    return %arg0, %c0_i32, %c0_i32_0 : i32, i32, i32
  }
}

</mosaic_0001>

<bundles_post_ra>
// kernel: dblock_forward.1
= control target key start
LH: loop header
LB: loop body
LE: loop exit
PB: predicated region body
PF: predicated region fallthrough
CT: control target
= control target key end

     0   :  { %s4400_s0 = inlined_call_operand.vmem [shape: f32[2,4,256], index: 0, kind: input, shape index: {}]   ;;  %s4401_s1 = inlined_call_operand.vmem [shape: f32[9,256], index: 1, kind: input, shape index: {}]   ;;  %s4402_s2 = inlined_call_operand.vmem [shape: f32[256,64], index: 2, kind: input, shape index: {}]   ;;  %s4403_s3 = inlined_call_operand.vmem [shape: f32[12,4], index: 3, kind: input, shape index: {}]   ;;  %s4404_s4 = inlined_call_operand.vmem [shape: f32[12,1], index: 4, kind: input, shape index: {}]   ;;  %s4405_s5 = inlined_call_operand.vmem [shape: f32[12,9], index: 5, kind: input, shape index: {}]   ;;  %s4406_s6 = inlined_call_operand.vmem [shape: f32[12,1], index: 6, kind: input, shape index: {}]   ;;  %s4407_s7 = inlined_call_operand.vmem [shape: f32[4,4], index: 7, kind: input, shape index: {}]   ;;  %s4408_s8 = inlined_call_operand.vmem [shape: f32[4,4], index: 8, kind: input, shape index: {}]   ;;  %s4409_s9 = inlined_call_operand.vmem [shape: f32[4,1], index: 9, kind: input, shape index: {}]   ;;  %s4410_s10 = inlined_call_operand.vmem [shape: f32[4,9], index: 10, kind: input, shape index: {}]   ;;  %s4411_s11 = inlined_call_operand.vmem [shape: f32[4,1], index: 11, kind: input, shape index: {}]   ;;  %s4412_s12 = inlined_call_operand.vmem [shape: f32[8,4], index: 12, kind: input, shape index: {}]   ;;  %s4413_s13 = inlined_call_operand.vmem [shape: f32[8,1], index: 13, kind: input, shape index: {}]   ;;  %s4414_s14 = inlined_call_operand.vmem [shape: f32[8,9], index: 14, kind: input, shape index: {}]   ;;  %s4415_s15 = inlined_call_operand.vmem [shape: f32[8,1], index: 15, kind: input, shape index: {}]   ;;  %s4416_s16 = inlined_call_operand.vmem [shape: f32[4,8], index: 16, kind: input, shape index: {}]   ;;  %s4417_s17 = inlined_call_operand.vmem [shape: f32[4,1], index: 17, kind: input, shape index: {}]   ;;  %s4418_s18 = inlined_call_operand.vmem [shape: f32[9,8,4], index: 18, kind: input, shape index: {}]   ;;  %s4419_s19 = inlined_call_operand.vmem [shape: f32[8,1], index: 19, kind: input, shape index: {}]   ;;  %s4420_s20 = inlined_call_operand.vmem [shape: f32[2,8,256], index: 20, kind: output, shape index: {0}]   ;;  %s4421_s21 = inlined_call_operand.vmem [shape: f32[2,8,64], index: 21, kind: output, shape index: {1}]  }
   0x1   :  { %4449 = sst [smem:[#allocation2_spill]] %s4400_s0 }
   0x2   :  { %4450 = sst [smem:[#allocation3_spill]] %s4401_s1 }
   0x3   :  { %4451 = sst [smem:[#allocation4_spill]] %s4402_s2  ;;  %s3538_s2 = smov 0  }
   0x4   :  { %4452 = sst [smem:[#allocation5_spill]] %s4403_s3 }
   0x5   :  { %4453 = sst [smem:[#allocation6_spill]] %s4404_s4 }
   0x6   :  { %4454 = sst [smem:[#allocation7_spill]] %s4405_s5 }
   0x7   :  { %4455 = sst [smem:[#allocation8_spill]] %s4406_s6 }
   0x8   :  { %4456 = sst [smem:[#allocation9_spill]] %s4410_s10 }
   0x9   :  { %4457 = sst [smem:[#allocation10_spill]] %s4411_s11 }
   0xa LB: > { %s3152_s25 = sadd.s32 4294967295, %s3407_s2   ;;  %p3156_p0 = scmp.ge.s32.totalorder %s3407_s2, 1  ;;  %s3407_s2 = sphi %s3538_s2, %s32_s2  }
   0xb   : > { %p590_p1 = scmp.lt.s32.totalorder %s3407_s2, 3 }
   0xd   : > { %p591_p2 = pnand %p3156_p0, %p590_p1 }
   0xe   : > { %p654_p3 = scmp.lt.s32.totalorder (!%p591_p2), %s3152_s25, 1  ;;  %vm676_vm0 = vcmask (!%p591_p2), 1043456   ;;  %s4458_s28 = sld [smem:[#allocation2_spill]] (!%p591_p2)  ;;  %v3409_v5 = vmov (!%p591_p2), 839922192   ;;  %v688_v7 = vlaneseq (!%p591_p2)  ;;  %v3410_v20 = vmov (!%p591_p2), 0.0  }
   0xf   : > { %594 = sbr.rel (%p591_p2) target bundleno = 3774 (0xebe), region = 100  ;;  %v686_v6 = vunpack.c.l.s4 (!%p591_p2), %v3409_v5  ;;  %807 = vmatprep.mubr.f32.mxu0 (!%p591_p2), %v3410_v20  ;;  %s4459_s30 = sld [smem:[#allocation6_spill]] (!%p591_p2)  ;;  %v3411_v23 = vmov (!%p591_p2), 0   ;;  %v3412_v25 = vmov (!%p591_p2), 4   ;;  %v4442_v26 = vmov (!%p591_p2), 6  }
  0x10   : > { %v3560_v9 = vshrl.u32 (!%p591_p2), %v688_v7, 7  ;;  %s4460_s6 = sld [smem:[#allocation8_spill]] (!%p591_p2)  ;;  %3326 = vset.pattern.permute.xlu1 (!%p591_p2), %v3411_v23  ;;  %3328 = vset.pattern.permute.xlu0 (!%p591_p2), %v3411_v23  ;;  %s4461_s24 = sld [smem:[#allocation7_spill]] (!%p591_p2)  ;;  %v4441_v27 = vmov (!%p591_p2), 7   ;;  %v3415_v28 = vmov (!%p591_p2), 1   ;;  %v3416_v29 = vmov (!%p591_p2), 2  }
  0x11   : > { %v687_v8 = vunpack.c.0.s8 (!%p591_p2), %v686_v6  ;;  %v3417_v30 = vmov (!%p591_p2), 3   ;;  %v3418_v31 = vmov (!%p591_p2), 5   ;;  %vm732_vm1 = vcmask (!%p591_p2), 31744   ;;  %s4436_s0 = smov (!%p591_p2), 1   ;;  %s4445_s4 = smov (!%p591_p2), 17  }
  0x12   : > { %v4440_v40 = vmov (!%p591_p2), 8   ;;  %s4443_s5 = smov (!%p591_p2), 16   ;;  %s4428_s22 = smov (!%p591_p2), 111   ;;  %v3638_v59 = vand.u32 (!%p591_p2), 127, %v688_v7  ;;  %v869_v62 = vsub.s32 (!%p591_p2), 0, %v3560_v9  ;;  %v951_v6 = vsub.s32 (!%p591_p2), 2, %v3560_v9 }
  0x13   : > { %v3563_v10 = vsub.s32 (!%p591_p2), %v687_v8, %v3560_v9  ;;  %s4438_s23 = smov (!%p591_p2), 15   ;;  %s4434_s1 = smov (!%p591_p2), 127   ;;  %vm1201_vm10 = vcmask (!%p591_p2), 1047556   ;;  %vm1295_vm15 = vcmask (!%p591_p2), 27648  }
  0x14   : > { %s4432_s27 = smov (!%p591_p2), 113   ;;  %s4430_s3 = smov (!%p591_p2), 112   ;;  %vm862_vm2 = vcmp.lt.s32.totalorder (!%p591_p2), %v3638_v59, 17  ;;  %vm903_vm3 = vcmp.lt.s32.totalorder (!%p591_p2), %v3638_v59, 16  ;;  %vm944_vm4 = vcmp.lt.s32.totalorder (!%p591_p2), %v3638_v59, 15  ;;  %vm985_vm5 = vcmp.lt.s32.totalorder (!%p591_p2), %v3638_v59, 1 }
  0x15   : > { %v718_v21 = vld [vmem:[%s4459_s30] sm:$0xff] (!%p591_p2)  ;;  %vm1026_vm6 = vcmp.lt.s32.totalorder (!%p591_p2), %v3638_v59, 127  ;;  %vm1067_vm7 = vcmp.lt.s32.totalorder (!%p591_p2), %v3638_v59, 113  ;;  %vm1108_vm8 = vcmp.lt.s32.totalorder (!%p591_p2), %v3638_v59, 112  ;;  %vm1149_vm9 = vcmp.lt.s32.totalorder (!%p591_p2), %v3638_v59, 111  ;;  %s4468_s10 = sld [smem:[#allocation9_spill]] (!%p591_p2) }
  0x16   : > { %s4480_s25 = smov (!%p654_p3, %s3152_s25), 1  ;;  %v822_v22 = vld [vmem:[%s4460_s6] sm:$0xff]  ;;  %722 = vperm.xlu1 %3326, %v718_v21   ;;  %s4469_s11 = sld [smem:[#allocation10_spill]] }
  0x17   : > { %s4427_s26 = sshll.u32 %s4480_s25, 3  ;;  %v820_v24 = vld [vmem:[%s4461_s24] sm:$0xff] }
  0x18   : > { %s3554_s29 = scalar_lea.vmem %s4458_s28, %s4427_s26  ;;  %s4462_s28 = sld [smem:[#allocation5_spill]] }
  0x19   : > { %v668_v0 = vld [vmem:[%s3554_s29] sm:$0xff]  ;;  %s4464_s26 = smov 127  }
  0x1a   : > { %v674_v1 = vcombine.high %v668_v0, %v668_v0  ;;  %v677_v2 = vsel %vm676_vm0, %v668_v0, 0.0  ;;  %3327 = vset.pattern.permute.xlu1 %v3412_v25 }
  0x1b   : > { %826 = vperm.xlu1 %3327, %v820_v24  }
  0x1c   : > { %v678_v3 = vsel %vm676_vm0, %v674_v1, 0.0  ;;  %v910_v1 = vsub.s32 1, %v3560_v9 }
  0x1d   : > { %v679_v4 = vadd.f32 %v678_v3, %v677_v2 }
  0x1e   : > { %v716_v39 = vld [vmem:[%s4462_s28] sm:$0xff] }
  0x1f   : > { %680 = vadd.xlane.f32.xlu0 %v679_v4  ;;  %3329 = vset.pattern.permute.xlu1 %v3411_v23 }
  0x20   : > { %880 = vperm.xlu1 %3329, %v820_v24  }
  0x24   : > { %3330 = vset.pattern.permute.xlu1 %v3415_v28 }
  0x25   : > { %921 = vperm.xlu1 %3330, %v820_v24  }
  0x29   : > { %3331 = vset.pattern.permute.xlu1 %v3416_v29 }
  0x2a   : > { %962 = vperm.xlu1 %3331, %v820_v24  }
  0x2e   : > { %3332 = vset.pattern.permute.xlu1 %v3417_v30 }
  0x2f   : > { %1003 = vperm.xlu1 %3332, %v820_v24  }
  0x33   : > { %3333 = vset.pattern.permute.xlu1 %v3418_v31 }
  0x34   : > { %1044 = vperm.xlu1 %3333, %v820_v24  }
  0x38   : > { %3338 = vset.pattern.permute.xlu1 %v3412_v25 }
  0x95   : > { %v723_v41 = vpop.permute.xlu1 %722 }
  0x9a   : > { %v827_v46 = vpop.permute.xlu1 %826 }
  0x9f   : > { %v881_v47 = vpop.permute.xlu1 %880 }
  0xa4   : > { %v3623_v48 = vpop.permute.xlu1 %921 }
  0xa9   : > { %v3625_v49 = vpop.permute.xlu1 %962 }
  0xac   : > { %v681_v11 = vpop.xlane.xlu0 %680 }
  0xad   : > { %v683_v12 = vmul.f32 0.00390625, %v681_v11 }
  0xae   : > { %v3627_v50 = vpop.permute.xlu1 %1003 }
  0xaf   : > { %v691_v13 = vrot.slane %v683_v12, %v3563_v10 }
  0xb1   : > { %v693_v14 = vsub.f32 %v668_v0, %v691_v13 }
  0xb3   : > { %v694_v15 = vmul.f32 %v693_v14, %v693_v14  ;;  %v3629_v51 = vpop.permute.xlu1 %1044 }
  0xb5   : > { %v696_v16 = vcombine.high %v694_v15, %v694_v15  ;;  %v698_v17 = vsel %vm676_vm0, %v694_v15, 0.0 }
  0xb7   : > { %v699_v18 = vsel %vm676_vm0, %v696_v16, 0.0 }
  0xb8   : > { %v700_v19 = vadd.f32 %v699_v18, %v698_v17  ;;  %v992_v18 = vsub.s32 3, %v3560_v9 }
  0xba   : > { %701 = vadd.xlane.f32.xlu0 %v700_v19 }
  0xd0   : > { %840 = vperm.xlu0 %3328, %v822_v22  }
  0xd4   : > { %3334 = vset.pattern.permute.xlu0 %v4442_v26 }
  0xd5   : > { %1085 = vperm.xlu0 %3334, %v820_v24  }
  0xd9   : > { %3335 = vset.pattern.permute.xlu0 %v4441_v27 }
  0xda   : > { %1126 = vperm.xlu0 %3335, %v820_v24  }
  0xde   : > { %3336 = vset.pattern.permute.xlu0 %v4440_v40 }
 0x147   : > { %v702_v32 = vpop.xlane.xlu0 %701 }
 0x148   : > { %v703_v33 = vmul.f32 0.00390625, %v702_v32 }
 0x14a   : > { %v704_v34 = vadd.f32 1e-05, %v703_v33  ;;  %v1033_v33 = vsub.s32 5, %v3560_v9 }
 0x14c   : > { %3378 = vrsqrt.f32 %v704_v34  ;;  %v1074_v34 = vsub.s32 6, %v3560_v9 }
 0x14f   : > { %v841_v58 = vpop.permute.xlu0 %840 }
 0x154   : > { %v3640_v61 = vpop.permute.xlu0 %1085 }
 0x156   : > { %v3379_v35 = vpop.eup %3378 }
 0x157   : > { %v713_v36 = vrot.slane %v3379_v35, %v3563_v10 }
 0x159   : > { %v3590_v37 = vmul.f32 %v713_v36, %v693_v14  ;;  %v3663_v7 = vpop.permute.xlu0 %1126 }
 0x15b   : > { %v3594_v38 = vcombine.high %v3590_v37, %v3590_v37 }
 0x15d   : > { %3162 = vmatprep.subr.msk.mxu0 %vm676_vm0, %v3594_v38 }
 0x15e   : > { %3163 = vmatpush1.msk.msra.mxu0 %vm676_vm0, %v3590_v37 }
 0x15f   : > { %3164 = vmatmul.mubr.msk.f32.vlgmr.msra.gmra.mrb[0].mxu0 %vm732_vm1, %v716_v39 }
 0x160   : > { %813 = vmatprep.mubr.f32.mxu0 %v3410_v20 }
 0x232   : > { %v809_v42 = vpop.f32.mrb[0].mxu0 }
 0x233   : > { %v810_v43 = vadd.f32 %v809_v42, %v723_v41  ;;  %v811_v44 = vpop.f32.mrb[1].mxu0 }
 0x234   : > { %v812_v45 = vadd.f32 %v811_v44, %v723_v41 }
 0x235   : > { %977 = vrot.lane.b32.xlu0 %v810_v43, %s4436_s0  ;;  %852 = vrot.lane.b32.xlu1 %v810_v43, %s4445_s4  ;;  %v834_v3 = vmul.f32 %v827_v46, %v810_v43 }
 0x236   : > { %v835_v12 = vmul.f32 %v827_v46, %v812_v45 }
 0x237   : > { %v848_v19 = vadd.f32 %v841_v58, %v834_v3 }
 0x239   : > { %1167 = vperm.xlu0 %3336, %v820_v24   ;;  %895 = vrot.lane.b32.xlu1 %v810_v43, %s4443_s5 }
 0x23d   : > { %1141 = vrot.lane.b32.xlu0 %v810_v43, %s4428_s22  ;;  %936 = vrot.lane.b32.xlu1 %v810_v43, %s4438_s23 }
 0x23e   : > { %3337 = vset.pattern.permute.xlu0 %v3411_v23 }
 0x241   : > { %1018 = vrot.lane.b32.xlu1 %v810_v43, %s4434_s1 }
 0x245   : > { %1059 = vrot.lane.b32.xlu1 %v810_v43, %s4432_s27 }
 0x249   : > { %1100 = vrot.lane.b32.xlu1 %v810_v43, %s4430_s3  ;;  %v849_v43 = vadd.f32 %v841_v58, %v835_v12 }
 0x24d   : > { %856 = vrot.lane.b32.xlu1 %v812_v45, %s4445_s4 }
 0x251   : > { %899 = vrot.lane.b32.xlu1 %v812_v45, %s4443_s5 }
 0x255   : > { %940 = vrot.lane.b32.xlu1 %v812_v45, %s4438_s23 }
 0x259   : > { %981 = vrot.lane.b32.xlu1 %v812_v45, %s4436_s0 }
 0x25d   : > { %1022 = vrot.lane.b32.xlu1 %v812_v45, %s4434_s1  ;;  %s4466_s1 = smov 112  }
 0x261   : > { %1063 = vrot.lane.b32.xlu1 %v812_v45, %s4432_s27  ;;  %s4467_s27 = smov 111  }
 0x265   : > { %1104 = vrot.lane.b32.xlu1 %v812_v45, %s4430_s3  ;;  %s4463_s3 = sld [smem:[#allocation3_spill]] }
 0x269   : > { %1145 = vrot.lane.b32.xlu1 %v812_v45, %s4428_s22  ;;  %s4465_s22 = smov 113  }
 0x26b   : > { %v3646_v63 = vld [vmem:[%s4463_s3] sm:$0xff]  ;;  %v3651_v0 = vld [vmem:[%s4463_s3 + $0x8] sm:$0xff] }
 0x26c   : > { %v3656_v4 = vrot.slane %v3646_v63, %v869_v62  ;;  %v3659_v5 = vrot.slane %v3651_v0, %v869_v62  ;;  %v3670_v13 = vrot.slane %v3646_v63, %v910_v1  ;;  %v3673_v14 = vrot.slane %v3651_v0, %v910_v1 }
 0x26d   : > { %v3684_v24 = vrot.slane %v3646_v63, %v951_v6  ;;  %v3687_v32 = vrot.slane %v3651_v0, %v951_v6  ;;  %v3699_v45 = vrot.slane %v3646_v63, %v992_v18  ;;  %v3702_v46 = vrot.slane %v3651_v0, %v992_v18 }
 0x26e   : > { %v3712_v1 = vrot.slane %v3646_v63, %v1033_v33  ;;  %v3732_v18 = vrot.slane %v3651_v0, %v1074_v34 }
 0x2a7   : > { %v853_v52 = vpop.permute.xlu1 %852  ;;  %v978_v44 = vpop.permute.xlu0 %977 }
 0x2ab   : > { %v896_v53 = vpop.permute.xlu1 %895 }
 0x2af   : > { %v937_v54 = vpop.permute.xlu1 %936 }
 0x2b3   : > { %v3631_v55 = vpop.permute.xlu1 %1018 }
 0x2b7   : > { %v3633_v56 = vpop.permute.xlu1 %1059 }
 0x2bb   : > { %v3635_v57 = vpop.permute.xlu1 %1100 }
 0x2bf   : > { %v857_v60 = vpop.permute.xlu1 %856 }
 0x2c0   : > { %v863_v8 = vsel %vm862_vm2, %v853_v52, %v857_v60  ;;  %v865_v11 = vsel %vm862_vm2, %v857_v60, %v853_v52 }
 0x2c1   : > { %v875_v21 = vmul.f32 %v3656_v4, %v865_v11  ;;  %v876_v22 = vmul.f32 %v3659_v5, %v863_v8  ;;  %v3721_v8 = vrot.slane %v3646_v63, %v1074_v34 }
 0x2c3   : > { %v900_v2 = vpop.permute.xlu1 %899  ;;  %v887_v52 = vmul.f32 %v881_v47, %v875_v21  ;;  %v1115_v21 = vsub.s32 7, %v3560_v9 }
 0x2c4   : > { %v904_v16 = vsel %vm903_vm3, %v896_v53, %v900_v2  ;;  %v906_v17 = vsel %vm903_vm3, %v900_v2, %v896_v53  ;;  %v888_v53 = vmul.f32 %v881_v47, %v876_v22  ;;  %v3715_v2 = vrot.slane %v3651_v0, %v1033_v33 }
 0x2c5   : > { %v916_v35 = vmul.f32 %v3670_v13, %v906_v17  ;;  %v917_v36 = vmul.f32 %v3673_v14, %v904_v16  ;;  %v891_v17 = vadd.f32 %v887_v52, %v848_v19  ;;  %v3751_v52 = vrot.slane %v3646_v63, %v1115_v21 }
 0x2c7   : > { %v941_v15 = vpop.permute.xlu1 %940  ;;  %v928_v3 = vmul.f32 %v3623_v48, %v916_v35  ;;  %v929_v47 = vmul.f32 %v3623_v48, %v917_v36  ;;  %v892_v48 = vadd.f32 %v888_v53, %v849_v43  ;;  %v3754_v53 = vrot.slane %v3651_v0, %v1115_v21 }
 0x2c8   : > { %v945_v39 = vsel %vm944_vm4, %v937_v54, %v941_v15  ;;  %v947_v41 = vsel %vm944_vm4, %v941_v15, %v937_v54 }
 0x2c9   : > { %v957_v54 = vmul.f32 %v3684_v24, %v947_v41  ;;  %v958_v58 = vmul.f32 %v3687_v32, %v945_v39  ;;  %v932_v35 = vadd.f32 %v928_v3, %v891_v17  ;;  %v933_v36 = vadd.f32 %v929_v47, %v892_v48 }
 0x2cb   : > { %v982_v42 = vpop.permute.xlu1 %981  ;;  %v969_v22 = vmul.f32 %v3625_v49, %v957_v54  ;;  %v970_v33 = vmul.f32 %v3625_v49, %v958_v58 }
 0x2cc   : > { %v986_v60 = vsel %vm985_vm5, %v978_v44, %v982_v42  ;;  %v988_v62 = vsel %vm985_vm5, %v982_v42, %v978_v44  ;;  %v1168_v42 = vpop.permute.xlu0 %1167 }
 0x2cd   : > { %v998_v11 = vmul.f32 %v3699_v45, %v988_v62  ;;  %v999_v12 = vmul.f32 %v3702_v46, %v986_v60  ;;  %v974_v60 = vadd.f32 %v970_v33, %v933_v36 }
 0x2cf   : > { %v1023_v6 = vpop.permute.xlu1 %1022  ;;  %v1010_v19 = vmul.f32 %v3627_v50, %v998_v11  ;;  %v1011_v34 = vmul.f32 %v3627_v50, %v999_v12  ;;  %v973_v50 = vadd.f32 %v969_v22, %v932_v35  ;;  %v3772_v12 = vld [vmem:[%s4463_s3 + $0x10] ss:$0 sm:$0xff] }
 0x2d0   : > { %v1027_v15 = vsel %vm1026_vm6, %v3631_v55, %v1023_v6  ;;  %v1029_v16 = vsel %vm1026_vm6, %v1023_v6, %v3631_v55 }
 0x2d1   : > { %v1039_v39 = vmul.f32 %v3712_v1, %v1027_v15  ;;  %v1040_v41 = vmul.f32 %v3715_v2, %v1029_v16  ;;  %v1015_v3 = vadd.f32 %v1011_v34, %v974_v60  ;;  %v3777_v15 = vld [vmem:[%s4463_s3 + $0x18] ss:$0 sm:$0xff]  ;;  %v1142_v16 = vpop.permute.xlu0 %1141 }
 0x2d3   : > { %v1064_v55 = vpop.permute.xlu1 %1063  ;;  %v1051_v62 = vmul.f32 %v3629_v51, %v1039_v39  ;;  %v1052_v54 = vmul.f32 %v3629_v51, %v1040_v41 }
 0x2d4   : > { %v1068_v9 = vsel %vm1067_vm7, %v3633_v56, %v1064_v55  ;;  %v1070_v49 = vsel %vm1067_vm7, %v1064_v55, %v3633_v56  ;;  %v1014_v56 = vadd.f32 %v1010_v19, %v973_v50 }
 0x2d5   : > { %v1080_v43 = vmul.f32 %v3721_v8, %v1068_v9  ;;  %v1081_v44 = vmul.f32 %v3732_v18, %v1070_v49  ;;  %v1056_v17 = vadd.f32 %v1052_v54, %v1015_v3  ;;  %v717_v3 = vld [vmem:[%s4462_s28 + $0x8] sm:$0xf] }
 0x2d6   : > { %3165 = vmatmul.mubr.msk.f32.gmra.mrb[2].mxu0 %vm732_vm1, %v717_v3 }
 0x2d7   : > { %v1105_v58 = vpop.permute.xlu1 %1104  ;;  %v1092_v0 = vmul.f32 %v3640_v61, %v1080_v43  ;;  %v1093_v6 = vmul.f32 %v3640_v61, %v1081_v44  ;;  %1645 = vmatprep.mubr.f32.mxu0 %v3410_v20 }
 0x2d8   : > { %v1109_v47 = vsel %vm1108_vm8, %v3635_v57, %v1105_v58  ;;  %v1111_v63 = vsel %vm1108_vm8, %v1105_v58, %v3635_v57  ;;  %v1055_v57 = vadd.f32 %v1051_v62, %v1014_v56 }
 0x2d9   : > { %v1121_v11 = vmul.f32 %v3751_v52, %v1109_v47  ;;  %v1122_v51 = vmul.f32 %v3754_v53, %v1111_v63  ;;  %v1097_v36 = vadd.f32 %v1093_v6, %v1056_v17 }
 0x2da   : > { %v1096_v35 = vadd.f32 %v1092_v0, %v1055_v57 }
 0x2db   : > { %v1133_v48 = vmul.f32 %v3663_v7, %v1121_v11  ;;  %v1134_v61 = vmul.f32 %v3663_v7, %v1122_v51  ;;  %v1146_v21 = vpop.permute.xlu1 %1145 }
 0x2dc   : > { %v1150_v22 = vsel %vm1149_vm9, %v1142_v16, %v1146_v21  ;;  %v1152_v33 = vsel %vm1149_vm9, %v1146_v21, %v1142_v16 }
 0x2dd   : > { %v1162_v39 = vmul.f32 %v3772_v12, %v1150_v22  ;;  %v1163_v41 = vmul.f32 %v3777_v15, %v1152_v33  ;;  %v1137_v55 = vadd.f32 %v1133_v48, %v1096_v35  ;;  %v1138_v19 = vadd.f32 %v1134_v61, %v1097_v36 }
 0x2df   : > { %v1174_v34 = vmul.f32 %v1168_v42, %v1162_v39  ;;  %v1175_v9 = vmul.f32 %v1168_v42, %v1163_v41 }
 0x2e1   : > { %v1178_v49 = vadd.f32 %v1174_v34, %v1137_v55  ;;  %v1179_v43 = vadd.f32 %v1175_v9, %v1138_v19  ;;  %v821_v9 = vld [vmem:[%s4461_s24 + $0x8] sm:$0xf] }
 0x2e3   : > { %v1183_v7 = vmul.f32 %v1178_v49, %v1178_v49  ;;  %v1184_v44 = vmul.f32 %v1179_v43, %v1179_v43 }
 0x2e5   : > { %v1202_v50 = vsel %vm1201_vm10, %v1183_v7, 0.0  ;;  %v1203_v60 = vsel %vm1201_vm10, %v1184_v44, 0.0  ;;  %v1185_v62 = vsel %vm676_vm0, %v1183_v7, 0.0  ;;  %v1186_v54 = vsel %vm676_vm0, %v1184_v44, 0.0 }
 0x2e6   : > { %v1204_v58 = vadd.f32 %v1203_v60, %v1202_v50  ;;  %v1187_v56 = vadd.f32 %v1186_v54, %v1185_v62  ;;  %v719_v62 = vld [vmem:[%s4459_s30 + $0x8] sm:$0xf] }
 0x2e8   : > { %1205 = vadd.xlane.f32.xlu0 %v1204_v58  ;;  %1188 = vadd.xlane.f32.xlu1 %v1187_v56 }
 0x2f9   : > { %831 = vperm.xlu1 %3338, %v821_v9  }
 0x2fd   : > { %3339 = vset.pattern.permute.xlu1 %v3411_v23 }
 0x375   : > { %v1206_v42 = vpop.xlane.xlu0 %1205  ;;  %v1189_v47 = vpop.xlane.xlu1 %1188 }
 0x376   : > { %3380 = vrsqrt.f32 %v1206_v42  ;;  %vm1209_vm11 = vcmp.eq.f32.partialorder %v1206_v42, inf  ;;  %v1212_v11 = vand.u32 2147483648, %v1206_v42  ;;  %vm1211_vm12 = vcmp.eq.f32.partialorder %v1206_v42, 0.0 }
 0x377   : > { %3382 = vrsqrt.f32 %v1189_v47  ;;  %vm1192_vm13 = vcmp.eq.f32.partialorder %v1189_v47, inf  ;;  %v1195_v57 = vand.u32 2147483648, %v1189_v47  ;;  %vm1194_vm14 = vcmp.eq.f32.partialorder %v1189_v47, 0.0 }
 0x380   : > { %v3381_v63 = vpop.eup %3380 }
 0x381   : > { %v3383_v0 = vpop.eup %3382  ;;  %v1208_v6 = vmul.f32 %v3381_v63, %v1206_v42 }
 0x382   : > { %v1191_v51 = vmul.f32 %v3383_v0, %v1189_v47 }
 0x383   : > { %v1210_v16 = vsel %vm1209_vm11, %v1206_v42, %v1208_v6  ;;  %vm2042_vm11 = vcmask 64512  }
 0x384   : > { %v1193_v17 = vsel %vm1192_vm13, %v1189_v47, %v1191_v51  ;;  %v1213_v48 = vsel %vm1211_vm12, %v1212_v11, %v1210_v16  ;;  %v1387_v47 = vld [vmem:[%s4468_s10] sm:$0xf] }
 0x385   : > { %v1196_v61 = vsel %vm1194_vm14, %v1195_v57, %v1193_v17  ;;  %v1214_v21 = vmax.f32 %v1213_v48, 1e-12  ;;  %v1388_v51 = vld [vmem:[%s4469_s11] sm:$0xf]  ;;  %s4475_s11 = smov 17  }
 0x386   : > { %v1197_v22 = vmax.f32 %v1196_v61, 1e-12 }
 0x387   : > { %3384 = vrcp.f32 %v1214_v21 }
 0x388   : > { %3386 = vrcp.f32 %v1197_v22 }
 0x391   : > { %v3385_v33 = vpop.eup %3384 }
 0x392   : > { %v3387_v35 = vpop.eup %3386  ;;  %v1217_v36 = vmul.f32 %v3385_v33, %v1179_v43  ;;  %v1216_v39 = vmul.f32 %v3385_v33, %v1178_v49 }
 0x393   : > { %v1200_v41 = vmul.f32 %v3387_v35, %v1179_v43  ;;  %v1199_v34 = vmul.f32 %v3387_v35, %v1178_v49  ;;  %v823_v43 = vld [vmem:[%s4460_s6 + $0x8] sm:$0xf]  ;;  %s4470_s6 = smov 15  }
 0x394   : > { %v1221_v55 = vrot.slane %v1217_v36, 4  ;;  %v1220_v19 = vrot.slane %v1216_v39, 4  ;;  %845 = vperm.xlu1 %3339, %v823_v43  }
 0x395   : > { %1288 = vmatprep.mubr.f32.mxu1 %v1200_v41 }
 0x396   : > { %1224 = vmatprep.subr.mxu1 %v1221_v55 }
 0x397   : > { %1225 = vmatpush1.xpose.msra.mxu1 %v1220_v19 }
 0x398   : > { %884 = vperm.xlu1 %3339, %v821_v9  }
 0x39a   : > { %1289 = vmatmul.mubr.f32.vlgmr.msra.gmra.mrb[0].mxu1 %v1199_v34 }
 0x39b   : > { %1380 = vmatprep.mubr.f32.mxu1 %v3410_v20 }
 0x39c   : > { %3343 = vset.pattern.permute.xlu1 %v3418_v31 }
 0x3a9   : > { %v815_v60 = vpop.f32.mrb[2].mxu0 }
 0x3aa   : > { %v817_v54 = vpop.f32.mrb[3].mxu0 }
 0x46d   : > { %v1290_v7 = vpop.f32.mrb[0].mxu1 }
 0x46e   : > { %v1294_v49 = vmul.f32 0.5, %v1290_v7  ;;  %v1292_v44 = vpop.f32.mrb[1].mxu1 }
 0x470   : > { %v1296_v50 = vsel %vm1295_vm15, %v1294_v49, -inf }
 0x471   : > { %1297 = vmax.xlane.f32.xlu0 %v1296_v50 }
 0x487   : > { %727 = vperm.xlu0 %3337, %v719_v62  }
 0x48b   : > { %3340 = vset.pattern.permute.xlu0 %v3415_v28 }
 0x48c   : > { %925 = vperm.xlu0 %3340, %v821_v9  }
 0x490   : > { %3341 = vset.pattern.permute.xlu0 %v3416_v29 }
 0x4fe   : > { %v1298_v58 = vpop.xlane.xlu0 %1297 }
 0x4ff   : > { %v1299_v63 = vsub.f32 %v1294_v49, %v1298_v58 }
 0x501   : > { %v1300_v0 = vmul.f32 1.442695, %v1299_v63 }
 0x503   : > { %3388 = vpow2.f32 %v1300_v0 }
 0x506   : > { %v728_v56 = vpop.permute.xlu0 %727 }
 0x507   : > { %v3809_v3 = vadd.f32 %v815_v60, %v728_v56  ;;  %v3815_v42 = vadd.f32 %v817_v54, %v728_v56 }
 0x509   : > { %897 = vrot.lane.b32.xlu1 %v3809_v3, %s4443_s5  ;;  %854 = vrot.lane.b32.xlu0 %v3809_v3, %s4445_s4 }
 0x50b   : > { %v926_v17 = vpop.permute.xlu0 %925 }
 0x50d   : > { %938 = vrot.lane.b32.xlu1 %v3809_v3, %s4438_s23  ;;  %858 = vrot.lane.b32.xlu0 %v3815_v42, %s4445_s4  ;;  %v3856_v6 = vpop.eup %3388 }
 0x50e   : > { %v1302_v11 = vsel %vm1295_vm15, %v3856_v6, 0.0 }
 0x511   : > { %1048 = vperm.xlu1 %3343, %v821_v9   ;;  %966 = vperm.xlu0 %3341, %v821_v9  }
 0x515   : > { %983 = vrot.lane.b32.xlu1 %v3815_v42, %s4436_s0  ;;  %901 = vrot.lane.b32.xlu0 %v3815_v42, %s4443_s5 }
 0x516   : > { %3342 = vset.pattern.permute.xlu0 %v3417_v30  ;;  %3348 = vset.pattern.permute.xlu1 %v3411_v23 }
 0x519   : > { %1020 = vrot.lane.b32.xlu1 %v3809_v3, %s4464_s26  ;;  %1007 = vperm.xlu0 %3342, %v821_v9  }
 0x51d   : > { %1024 = vrot.lane.b32.xlu1 %v3815_v42, %s4464_s26  ;;  %942 = vrot.lane.b32.xlu0 %v3815_v42, %s4438_s23 }
 0x51e   : > { %3344 = vset.pattern.permute.xlu0 %v4442_v26 }
 0x521   : > { %1061 = vrot.lane.b32.xlu1 %v3809_v3, %s4465_s22  ;;  %979 = vrot.lane.b32.xlu0 %v3809_v3, %s4436_s0  ;;  %s4471_s0 = smov 1  }
 0x525   : > { %1065 = vrot.lane.b32.xlu1 %v3815_v42, %s4465_s22  ;;  %1089 = vperm.xlu0 %3344, %v821_v9  }
 0x529   : > { %1102 = vrot.lane.b32.xlu1 %v3809_v3, %s4466_s1  ;;  %3345 = vset.pattern.permute.xlu0 %v4441_v27 }
 0x52a   : > { %1130 = vperm.xlu0 %3345, %v821_v9  }
 0x52d   : > { %1106 = vrot.lane.b32.xlu1 %v3815_v42, %s4466_s1 }
 0x52e   : > { %3346 = vset.pattern.permute.xlu0 %v4440_v40 }
 0x52f   : > { %1171 = vperm.xlu0 %3346, %v821_v9  }
 0x533   : > { %1143 = vrot.lane.b32.xlu0 %v3809_v3, %s4467_s27 }
 0x534   : > { %3347 = vset.pattern.permute.xlu0 %v3412_v25 }
 0x537   : > { %1391 = vperm.xlu0 %3347, %v1387_v47  }
 0x53b   : > { %3349 = vset.pattern.permute.xlu0 %v3415_v28 }
 0x53c   : > { %1444 = vperm.xlu0 %3349, %v1387_v47  }
 0x540   : > { %3350 = vset.pattern.permute.xlu0 %v3416_v29 }
 0x541   : > { %1463 = vperm.xlu0 %3350, %v1387_v47  }
 0x545   : > { %3351 = vset.pattern.permute.xlu0 %v3417_v30 }
 0x546   : > { %1482 = vperm.xlu0 %3351, %v1387_v47  }
 0x54a   : > { %3352 = vset.pattern.permute.xlu0 %v3418_v31 }
 0x54b   : > { %1501 = vperm.xlu0 %3352, %v1387_v47  }
 0x54f   : > { %3353 = vset.pattern.permute.xlu0 %v4442_v26 }
 0x550   : > { %1520 = vperm.xlu0 %3353, %v1387_v47  }
 0x551   : > { %1303 = vadd.xlane.f32.xlu1 %v1302_v11 }
 0x554   : > { %3354 = vset.pattern.permute.xlu0 %v4441_v27 }
 0x555   : > { %1539 = vperm.xlu0 %3354, %v1387_v47  }
 0x559   : > { %3355 = vset.pattern.permute.xlu0 %v4440_v40 }
 0x55a   : > { %1558 = vperm.xlu0 %3355, %v1387_v47  }
 0x55e   : > { %1549 = vrot.lane.b32.xlu0 %v3590_v37, %s4467_s27 }
 0x55f   : > { %3356 = vset.pattern.permute.xlu0 %v3411_v23 }
 0x562   : > { %1147 = vrot.lane.b32.xlu1 %v3815_v42, %s4467_s27 }
 0x566   : > { %1404 = vperm.xlu1 %3348, %v1388_v51  }
 0x56a   : > { %1425 = vperm.xlu1 %3348, %v1387_v47  }
 0x56e   : > { %1416 = vrot.lane.b32.xlu1 %v3590_v37, %s4445_s4 }
 0x56f   : > { %3357 = vset.pattern.permute.xlu1 %v3412_v25  ;;  %v832_v25 = vpop.permute.xlu1 %831 }
 0x570   : > { %v836_v54 = vmul.f32 %v832_v25, %v3809_v3  ;;  %v837_v58 = vmul.f32 %v832_v25, %v3815_v42 }
 0x572   : > { %1418 = vrot.lane.b32.xlu1 %v3594_v38, %s4445_s4  ;;  %s3211_s4 = sshll.u32 %s4480_s25, 4 }
 0x573   : > { %v846_v16 = vpop.permute.xlu1 %845  ;;  %s663_s10 = scalar_lea.vmem %s4420_s20, %s3211_s4 }
 0x576   : > { %1435 = vrot.lane.b32.xlu1 %v3590_v37, %s4443_s5 }
 0x577   : > { %v885_v57 = vpop.permute.xlu1 %884 }
 0x57a   : > { %1437 = vrot.lane.b32.xlu1 %v3594_v38, %s4443_s5  ;;  %s4478_s5 = sshll.u32 %s4480_s25, 3 }
 0x57b   : > { %v898_v48 = vpop.permute.xlu1 %897  ;;  %v855_v61 = vpop.permute.xlu0 %854 }
 0x57e   : > { %1454 = vrot.lane.b32.xlu1 %v3590_v37, %s4470_s6 }
 0x57f   : > { %v939_v21 = vpop.permute.xlu1 %938  ;;  %v859_v33 = vpop.permute.xlu0 %858 }
 0x580   : > { %v864_v43 = vsel %vm862_vm2, %v855_v61, %v859_v33  ;;  %v866_v7 = vsel %vm862_vm2, %v859_v33, %v855_v61 }
 0x581   : > { %v877_v60 = vmul.f32 %v3656_v4, %v866_v7  ;;  %v878_v62 = vmul.f32 %v3659_v5, %v864_v43 }
 0x582   : > { %1456 = vrot.lane.b32.xlu1 %v3594_v38, %s4470_s6 }
 0x583   : > { %v889_v3 = vmul.f32 %v885_v57, %v877_v60  ;;  %v890_v61 = vmul.f32 %v885_v57, %v878_v62 }
 0x586   : > { %1473 = vrot.lane.b32.xlu1 %v3590_v37, %s4471_s0 }
 0x58a   : > { %1475 = vrot.lane.b32.xlu1 %v3594_v38, %s4471_s0 }
 0x58e   : > { %1492 = vrot.lane.b32.xlu1 %v3590_v37, %s4464_s26 }
 0x590   : > { %v3902_v22 = vpop.permute.xlu1 %1048  ;;  %v967_v35 = vpop.permute.xlu0 %966 }
 0x592   : > { %1494 = vrot.lane.b32.xlu1 %v3594_v38, %s4464_s26 }
 0x594   : > { %v984_v36 = vpop.permute.xlu1 %983  ;;  %v902_v39 = vpop.permute.xlu0 %901 }
 0x595   : > { %v905_v44 = vsel %vm903_vm3, %v898_v48, %v902_v39  ;;  %v907_v50 = vsel %vm903_vm3, %v902_v39, %v898_v48  ;;  %v850_v39 = vadd.f32 %v846_v16, %v836_v54 }
 0x596   : > { %1511 = vrot.lane.b32.xlu1 %v3590_v37, %s4465_s22  ;;  %v918_v63 = vmul.f32 %v3670_v13, %v907_v50  ;;  %v919_v0 = vmul.f32 %v3673_v14, %v905_v44 }
 0x597   : > { %v893_v50 = vadd.f32 %v889_v3, %v850_v39 }
 0x598   : > { %v1021_v41 = vpop.permute.xlu1 %1020  ;;  %v1008_v55 = vpop.permute.xlu0 %1007  ;;  %v931_v43 = vmul.f32 %v926_v17, %v919_v0 }
 0x59a   : > { %1513 = vrot.lane.b32.xlu1 %v3594_v38, %s4465_s22 }
 0x59c   : > { %v1025_v19 = vpop.permute.xlu1 %1024  ;;  %v943_v34 = vpop.permute.xlu0 %942 }
 0x59d   : > { %v946_v56 = vsel %vm944_vm4, %v939_v21, %v943_v34  ;;  %v948_v47 = vsel %vm944_vm4, %v943_v34, %v939_v21  ;;  %v851_v21 = vadd.f32 %v846_v16, %v837_v58  ;;  %v930_v34 = vmul.f32 %v926_v17, %v918_v63 }
 0x59e   : > { %1530 = vrot.lane.b32.xlu1 %v3590_v37, %s4466_s1  ;;  %v959_v42 = vmul.f32 %v3684_v24, %v948_v47  ;;  %v960_v25 = vmul.f32 %v3687_v32, %v946_v56  ;;  %v1028_v57 = vsel %vm1026_vm6, %v1021_v41, %v1025_v19 }
 0x59f   : > { %v894_v40 = vadd.f32 %v890_v61, %v851_v21  ;;  %v934_v60 = vadd.f32 %v930_v34, %v893_v50  ;;  %v1041_v63 = vmul.f32 %v3712_v1, %v1028_v57 }
 0x5a0   : > { %v1062_v9 = vpop.permute.xlu1 %1061  ;;  %v971_v27 = vmul.f32 %v967_v35, %v959_v42  ;;  %v972_v26 = vmul.f32 %v967_v35, %v960_v25 }
 0x5a1   : > { %v935_v62 = vadd.f32 %v931_v43, %v894_v40 }
 0x5a2   : > { %1532 = vrot.lane.b32.xlu1 %v3594_v38, %s4466_s1  ;;  %v975_v47 = vadd.f32 %v971_v27, %v934_v60  ;;  %v1053_v27 = vmul.f32 %v3902_v22, %v1041_v63 }
 0x5a3   : > { %v976_v35 = vadd.f32 %v972_v26, %v935_v62 }
 0x5a4   : > { %v1066_v49 = vpop.permute.xlu1 %1065 }
 0x5a5   : > { %v1069_v58 = vsel %vm1067_vm7, %v1062_v9, %v1066_v49  ;;  %v1071_v56 = vsel %vm1067_vm7, %v1066_v49, %v1062_v9 }
 0x5a6   : > { %1551 = vrot.lane.b32.xlu1 %v3594_v38, %s4467_s27  ;;  %v980_v38 = vpop.permute.xlu0 %979 }
 0x5a7   : > { %v987_v51 = vsel %vm985_vm5, %v980_v38, %v984_v36  ;;  %v989_v48 = vsel %vm985_vm5, %v984_v36, %v980_v38  ;;  %v1030_v38 = vsel %vm1026_vm6, %v1025_v19, %v1021_v41 }
 0x5a8   : > { %v1103_v33 = vpop.permute.xlu1 %1102  ;;  %v1000_v7 = vmul.f32 %v3699_v45, %v989_v48  ;;  %v1001_v44 = vmul.f32 %v3702_v46, %v987_v51  ;;  %v1042_v0 = vmul.f32 %v3715_v2, %v1030_v38  ;;  %v1082_v51 = vmul.f32 %v3721_v8, %v1069_v58 }
 0x5a9   : > { %v1083_v48 = vmul.f32 %v3732_v18, %v1071_v56 }
 0x5aa   : > { %v1090_v11 = vpop.permute.xlu0 %1089  ;;  %v1012_v16 = vmul.f32 %v1008_v55, %v1000_v7  ;;  %v1013_v54 = vmul.f32 %v1008_v55, %v1001_v44  ;;  %v1054_v26 = vmul.f32 %v3902_v22, %v1042_v0 }
 0x5ab   : > { %v1095_v39 = vmul.f32 %v1090_v11, %v1083_v48 }
 0x5ac   : > { %v1107_v17 = vpop.permute.xlu1 %1106  ;;  %v1016_v55 = vadd.f32 %v1012_v16, %v975_v47  ;;  %v1017_v19 = vadd.f32 %v1013_v54, %v976_v35 }
 0x5ad   : > { %v1110_v41 = vsel %vm1108_vm8, %v1103_v33, %v1107_v17  ;;  %v1112_v40 = vsel %vm1108_vm8, %v1107_v17, %v1103_v33  ;;  %v1094_v33 = vmul.f32 %v1090_v11, %v1082_v51 }
 0x5ae   : > { %v1131_v36 = vpop.permute.xlu0 %1130  ;;  %v1123_v9 = vmul.f32 %v3751_v52, %v1110_v41  ;;  %v1124_v49 = vmul.f32 %v3754_v53, %v1112_v40  ;;  %v1057_v42 = vadd.f32 %v1053_v27, %v1016_v55  ;;  %v1058_v25 = vadd.f32 %v1054_v26, %v1017_v19 }
 0x5b0   : > { %v1135_v21 = vmul.f32 %v1131_v36, %v1123_v9  ;;  %v1136_v34 = vmul.f32 %v1131_v36, %v1124_v49  ;;  %v1098_v50 = vadd.f32 %v1094_v33, %v1057_v42  ;;  %v1099_v57 = vadd.f32 %v1095_v39, %v1058_v25 }
 0x5b2   : > { %v1172_v3 = vpop.permute.xlu0 %1171  ;;  %v1139_v62 = vadd.f32 %v1135_v21, %v1098_v50  ;;  %v1140_v16 = vadd.f32 %v1136_v34, %v1099_v57 }
 0x5b6   : > { %v1144_v43 = vpop.permute.xlu0 %1143 }
 0x5ba   : > { %v1392_v40 = vpop.permute.xlu0 %1391 }
 0x5bb   : > { %v1399_v57 = vrot.slane %v1392_v40, %v3563_v10 }
 0x5be   : > { %v1445_v19 = vpop.permute.xlu0 %1444 }
 0x5c2   : > { %v1464_v48 = vpop.permute.xlu0 %1463 }
 0x5de   : > { %v1304_v61 = vpop.xlane.xlu1 %1303 }
 0x5df   : > { %3390 = vrcp.f32 %v1304_v61 }
 0x5e2   : > { %v1148_v7 = vpop.permute.xlu1 %1147 }
 0x5e3   : > { %v1151_v44 = vsel %vm1149_vm9, %v1144_v43, %v1148_v7  ;;  %v1153_v22 = vsel %vm1149_vm9, %v1148_v7, %v1144_v43 }
 0x5e4   : > { %v1164_v38 = vmul.f32 %v3772_v12, %v1151_v44  ;;  %v1165_v60 = vmul.f32 %v3777_v15, %v1153_v22 }
 0x5e6   : > { %v1176_v54 = vmul.f32 %v1172_v3, %v1164_v38  ;;  %v1177_v11 = vmul.f32 %v1172_v3, %v1165_v60  ;;  %v1405_v17 = vpop.permute.xlu1 %1404 }
 0x5e8   : > { %v1180_v36 = vadd.f32 %v1176_v54, %v1139_v62  ;;  %v1181_v58 = vadd.f32 %v1177_v11, %v1140_v16  ;;  %v1412_v11 = vrot.slane %v1405_v17, %v3563_v10  ;;  %v1401_v17 = vmul.f32 %v1399_v57, %v3590_v37 }
 0x5e9   : > { %v3391_v56 = vpop.eup %3390 }
 0x5ea   : > { %v1306_v47 = vmul.f32 %v3391_v56, %v3856_v6  ;;  %3168 = vmatprep.subr.msk.mxu1 %vm676_vm0, %v1181_v58  ;;  %v1426_v35 = vpop.permute.xlu1 %1425  ;;  %v1483_v6 = vpop.permute.xlu0 %1482 }
 0x5eb   : > { %3169 = vmatpush1.msk.msra.mxu1 %vm676_vm0, %v1180_v36 }
 0x5ec   : > { %3170 = vmatmul.mubr.msk.f32.vlgmr.msra.gmra.mrb[2].mxu1 %vm732_vm1, %v1306_v47 }
 0x5ed   : > { %1866 = vmatprep.mubr.f32.mxu1 %v3410_v20 }
 0x5ee   : > { %v1417_v63 = vpop.permute.xlu1 %1416  ;;  %v1502_v9 = vpop.permute.xlu0 %1501 }
 0x5f2   : > { %v1419_v0 = vpop.permute.xlu1 %1418  ;;  %v1521_v43 = vpop.permute.xlu0 %1520 }
 0x5f3   : > { %v1420_v61 = vsel %vm862_vm2, %v1417_v63, %v1419_v0  ;;  %v1421_v42 = vsel %vm862_vm2, %v1419_v0, %v1417_v63 }
 0x5f4   : > { %v1422_v21 = vmul.f32 %v1421_v42, %v3656_v4  ;;  %v1423_v34 = vmul.f32 %v1420_v61, %v3659_v5  ;;  %v1414_v42 = vadd.f32 %v1412_v11, %v1401_v17 }
 0x5f6   : > { %v1436_v41 = vpop.permute.xlu1 %1435  ;;  %v1428_v60 = vmul.f32 %v1426_v35, %v1422_v21  ;;  %v1429_v62 = vmul.f32 %v1426_v35, %v1423_v34  ;;  %v1540_v0 = vpop.permute.xlu0 %1539 }
 0x5fa   : > { %v1438_v55 = vpop.permute.xlu1 %1437 }
 0x5fb   : > { %v1439_v25 = vsel %vm903_vm3, %v1436_v41, %v1438_v55  ;;  %v1440_v33 = vsel %vm903_vm3, %v1438_v55, %v1436_v41 }
 0x5fc   : > { %v1441_v7 = vmul.f32 %v1440_v33, %v3670_v13  ;;  %v1442_v44 = vmul.f32 %v1439_v25, %v3673_v14 }
 0x5fe   : > { %v1455_v51 = vpop.permute.xlu1 %1454  ;;  %v1447_v56 = vmul.f32 %v1445_v19, %v1441_v7  ;;  %v1448_v47 = vmul.f32 %v1445_v19, %v1442_v44  ;;  %v1559_v7 = vpop.permute.xlu0 %1558 }
 0x600   : > { %v1451_v25 = vcombine.low %v1447_v56, %v1448_v47 }
 0x602   : > { %v1457_v3 = vpop.permute.xlu1 %1456  ;;  %v1550_v47 = vpop.permute.xlu0 %1549 }
 0x603   : > { %v1458_v22 = vsel %vm944_vm4, %v1455_v51, %v1457_v3  ;;  %v1459_v50 = vsel %vm944_vm4, %v1457_v3, %v1455_v51  ;;  %v1432_v51 = vcombine.low %v1428_v60, %v1429_v62 }
 0x604   : > { %v1460_v36 = vmul.f32 %v1459_v50, %v3684_v24  ;;  %v1461_v58 = vmul.f32 %v1458_v22, %v3687_v32 }
 0x605   : > { %v1434_v44 = vadd.f32 %v1432_v51, %v1414_v42 }
 0x606   : > { %v1474_v27 = vpop.permute.xlu1 %1473 }
 0x60a   : > { %v1476_v26 = vpop.permute.xlu1 %1475 }
 0x60b   : > { %v1477_v16 = vsel %vm985_vm5, %v1474_v27, %v1476_v26  ;;  %v1478_v54 = vsel %vm985_vm5, %v1476_v26, %v1474_v27  ;;  %v1466_v27 = vmul.f32 %v1464_v48, %v1460_v36  ;;  %v1467_v26 = vmul.f32 %v1464_v48, %v1461_v58 }
 0x60c   : > { %v1479_v41 = vmul.f32 %v1478_v54, %v3699_v45  ;;  %v1480_v40 = vmul.f32 %v1477_v16, %v3702_v46 }
 0x60d   : > { %v1470_v22 = vcombine.low %v1466_v27, %v1467_v26 }
 0x60e   : > { %v1493_v49 = vpop.permute.xlu1 %1492  ;;  %v1485_v33 = vmul.f32 %v1483_v6, %v1479_v41 }
 0x612   : > { %v1495_v39 = vpop.permute.xlu1 %1494 }
 0x613   : > { %v1496_v63 = vsel %vm1026_vm6, %v1493_v49, %v1495_v39  ;;  %v1497_v35 = vsel %vm1026_vm6, %v1495_v39, %v1493_v49  ;;  %v1486_v39 = vmul.f32 %v1483_v6, %v1480_v40 }
 0x614   : > { %v1498_v61 = vmul.f32 %v1496_v63, %v3712_v1  ;;  %v1499_v49 = vmul.f32 %v1497_v35, %v3715_v2 }
 0x615   : > { %v1489_v48 = vcombine.low %v1485_v33, %v1486_v39 }
 0x616   : > { %v1512_v38 = vpop.permute.xlu1 %1511  ;;  %v1504_v50 = vmul.f32 %v1502_v9, %v1498_v61  ;;  %v1505_v57 = vmul.f32 %v1502_v9, %v1499_v49 }
 0x618   : > { %v1508_v36 = vcombine.low %v1504_v50, %v1505_v57 }
 0x61a   : > { %v1514_v55 = vpop.permute.xlu1 %1513 }
 0x61b   : > { %v1515_v3 = vsel %vm1067_vm7, %v1512_v38, %v1514_v55  ;;  %v1516_v19 = vsel %vm1067_vm7, %v1514_v55, %v1512_v38  ;;  %v1453_v38 = vadd.f32 %v1451_v25, %v1434_v44 }
 0x61c   : > { %v1517_v21 = vmul.f32 %v1515_v3, %v3721_v8  ;;  %v1518_v37 = vmul.f32 %v1516_v19, %v3732_v18 }
 0x61d   : > { %v1472_v11 = vadd.f32 %v1470_v22, %v1453_v38 }
 0x61e   : > { %v1531_v34 = vpop.permute.xlu1 %1530  ;;  %v1523_v60 = vmul.f32 %v1521_v43, %v1517_v21  ;;  %v1524_v62 = vmul.f32 %v1521_v43, %v1518_v37  ;;  %v1571_v21 = vld [vmem:[%s4408_s8] sm:$0xf] }
 0x61f   : > { %v1491_v63 = vadd.f32 %v1489_v48, %v1472_v11  ;;  %v3398_v48 = vld [vmem:[%s3554_s29] sm:$0xff]  ;;  %s4476_s29 = smov 16  }
 0x620   : > { %v1527_v9 = vcombine.low %v1523_v60, %v1524_v62 }
 0x621   : > { %v1510_v17 = vadd.f32 %v1508_v36, %v1491_v63 }
 0x622   : > { %v1533_v16 = vpop.permute.xlu1 %1532 }
 0x623   : > { %v1534_v54 = vsel %vm1108_vm8, %v1531_v34, %v1533_v16  ;;  %v1535_v6 = vsel %vm1108_vm8, %v1533_v16, %v1531_v34  ;;  %v1529_v27 = vadd.f32 %v1527_v9, %v1510_v17  ;;  %v1182_v34 = vld [vmem:[%s4407_s7] sm:$0xf]  ;;  %v4473_v17 = vmov 7  }
 0x624   : > { %v1536_v58 = vmul.f32 %v1534_v54, %v3751_v52  ;;  %v1537_v56 = vmul.f32 %v1535_v6, %v3754_v53 }
 0x626   : > { %v1542_v35 = vmul.f32 %v1540_v0, %v1536_v58  ;;  %v1543_v41 = vmul.f32 %v1540_v0, %v1537_v56  ;;  %v1552_v40 = vpop.permute.xlu1 %1551 }
 0x627   : > { %v1553_v43 = vsel %vm1149_vm9, %v1550_v47, %v1552_v40  ;;  %v1554_v55 = vsel %vm1149_vm9, %v1552_v40, %v1550_v47  ;;  %v1787_v40 = vld [vmem:[%s4413_s13] sm:$0xff] }
 0x628   : > { %v1546_v51 = vcombine.low %v1542_v35, %v1543_v41  ;;  %v1555_v3 = vmul.f32 %v3772_v12, %v1553_v43  ;;  %v1556_v19 = vmul.f32 %v3777_v15, %v1554_v55  ;;  %v1732_v12 = vld [vmem:[%s4409_s9] sm:$0xf] }
 0x629   : > { %1735 = vperm.xlu0 %3356, %v1732_v12   ;;  %v1873_v43 = vld [vmem:[%s4414_s14] sm:$0xff] }
 0x62a   : > { %v1561_v26 = vmul.f32 %v1559_v7, %v1555_v3  ;;  %v1562_v61 = vmul.f32 %v1559_v7, %v1556_v19  ;;  %v1548_v49 = vadd.f32 %v1546_v51, %v1529_v27  ;;  %v1874_v55 = vld [vmem:[%s4415_s15] sm:$0xff]  ;;  %v4474_v51 = vmov 8  }
 0x62c   : > { %v1565_v42 = vcombine.low %v1561_v26, %v1562_v61  ;;  %v1786_v61 = vld [vmem:[%s4412_s12] sm:$0xff] }
 0x62e   : > { %v1567_v25 = vadd.f32 %v1565_v42, %v1548_v49 }
 0x630   : > { %vm1568_vm10 = vcmp.ge.f32.partialorder %v1567_v25, 0.0  ;;  %v1569_v0 = vmul.f32 0.2, %v1567_v25 }
 0x632   : > { %v1570_v33 = vsel %vm1568_vm10, %v1567_v25, %v1569_v0  ;;  %v2036_v0 = vld [vmem:[%s4417_s17] sm:$0xf] }
 0x633   : > { %v1573_v39 = vcombine.high %v1570_v33, %v1570_v33 }
 0x635   : > { %3171 = vmatprep.subr.msk.mxu0 %vm676_vm0, %v1573_v39 }
 0x636   : > { %3172 = vmatpush1.msk.msra.mxu0 %vm676_vm0, %v1570_v33 }
 0x637   : > { %3173 = vmatmul.mubr.msk.f32.vlgmr.msra.gmra.mrb[4].mxu0 %vm732_vm1, %v1571_v21 }
 0x638   : > { %1725 = vmatprep.mubr.f32.mxu0 %v3410_v20 }
 0x6a8   : > { %v1736_v7 = vpop.permute.xlu0 %1735 }
 0x6bf   : > { %v1382_v15 = vpop.f32.mrb[2].mxu1 }
 0x6c0   : > { %v1384_v37 = vpop.f32.mrb[3].mxu1 }
 0x6c1   : > { %3174 = vmatprep.subr.msk.mxu0 %vm676_vm0, %v1384_v37 }
 0x6c2   : > { %3175 = vmatpush1.msk.msra.mxu0 %vm676_vm0, %v1382_v15 }
 0x6c3   : > { %3176 = vmatmul.mubr.msk.f32.vlgmr.msra.gmra.mrb[4].mxu0 %vm732_vm1, %v1182_v34 }
 0x6c4   : > { %2210 = vmatprep.mubr.f32.mxu0 %v3410_v20 }
 0x796   : > { %v1727_v44 = vpop.f32.mrb[4].mxu0 }
 0x797   : > { %v1738_v22 = vadd.f32 %v1736_v7, %v1727_v44  ;;  %v1729_v50 = vpop.f32.mrb[5].mxu0 }
 0x798   : > { %v1739_v57 = vadd.f32 %v1736_v7, %v1729_v50 }
 0x79a   : > { %v1742_v38 = vcombine.low %v1738_v22, %v1739_v57 }
 0x79c   : > { %v4030_v60 = vadd.f32 %v3398_v48, %v1742_v38 }
 0x79e   : > { %v1746_v62 = vcombine.high %v4030_v60, %v4030_v60  ;;  %v1748_v16 = vsel %vm676_vm0, %v4030_v60, 0.0 }
 0x7a0   : > { %v1749_v54 = vsel %vm676_vm0, %v1746_v62, 0.0 }
 0x7a1   : > { %v1750_v6 = vadd.f32 %v1749_v54, %v1748_v16 }
 0x7a3   : > { %1751 = vadd.xlane.f32.xlu1 %v1750_v6 }
 0x7b4   : > { %1877 = vperm.xlu1 %3357, %v1873_v43  }
 0x7b8   : > { %3358 = vset.pattern.permute.xlu1 %v3411_v23 }
 0x7b9   : > { %1884 = vperm.xlu1 %3358, %v1874_v55  }
 0x7bd   : > { %1898 = vperm.xlu1 %3358, %v1873_v43  }
 0x830   : > { %v1752_v11 = vpop.xlane.xlu1 %1751 }
 0x831   : > { %v1753_v36 = vmul.f32 0.00390625, %v1752_v11 }
 0x833   : > { %v1761_v58 = vrot.slane %v1753_v36, %v3563_v10 }
 0x834   : > { %v1878_v33 = vpop.permute.xlu1 %1877 }
 0x835   : > { %v1763_v56 = vsub.f32 %v4030_v60, %v1761_v58 }
 0x837   : > { %v1764_v47 = vmul.f32 %v1763_v56, %v1763_v56 }
 0x838   : > { %v1885_v39 = vpop.permute.xlu1 %1884 }
 0x839   : > { %v1766_v63 = vcombine.high %v1764_v47, %v1764_v47  ;;  %v1768_v9 = vsel %vm676_vm0, %v1764_v47, 0.0 }
 0x83b   : > { %v1769_v35 = vsel %vm676_vm0, %v1766_v63, 0.0 }
 0x83c   : > { %v1770_v41 = vadd.f32 %v1769_v35, %v1768_v9  ;;  %v1899_v21 = vpop.permute.xlu1 %1898 }
 0x83e   : > { %1771 = vadd.xlane.f32.xlu0 %v1770_v41 }
 0x854   : > { %1790 = vperm.xlu0 %3356, %v1787_v40  }
 0x858   : > { %3359 = vset.pattern.permute.xlu0 %v3415_v28  ;;  %v4472_v28 = vmov 6  }
 0x859   : > { %1914 = vperm.xlu0 %3359, %v1873_v43  }
 0x85d   : > { %3360 = vset.pattern.permute.xlu0 %v3416_v29 }
 0x85e   : > { %1930 = vperm.xlu0 %3360, %v1873_v43  }
 0x862   : > { %3361 = vset.pattern.permute.xlu0 %v3417_v30 }
 0x863   : > { %1946 = vperm.xlu0 %3361, %v1873_v43  }
 0x867   : > { %3362 = vset.pattern.permute.xlu0 %v3418_v31 }
 0x868   : > { %1962 = vperm.xlu0 %3362, %v1873_v43  }
 0x86c   : > { %3363 = vset.pattern.permute.xlu0 %v4472_v28 }
 0x86d   : > { %1978 = vperm.xlu0 %3363, %v1873_v43  }
 0x871   : > { %3364 = vset.pattern.permute.xlu0 %v4473_v17 }
 0x872   : > { %1994 = vperm.xlu0 %3364, %v1873_v43  }
 0x876   : > { %3365 = vset.pattern.permute.xlu0 %v4474_v51 }
 0x877   : > { %2010 = vperm.xlu0 %3365, %v1873_v43  }
 0x87b   : > { %3366 = vset.pattern.permute.xlu0 %v3411_v23 }
 0x8cb   : > { %v1772_v29 = vpop.xlane.xlu0 %1771 }
 0x8cc   : > { %v1773_v3 = vmul.f32 0.00390625, %v1772_v29 }
 0x8ce   : > { %v1774_v19 = vadd.f32 1e-05, %v1773_v3 }
 0x8d0   : > { %3392 = vrsqrt.f32 %v1774_v19 }
 0x8d3   : > { %v1791_v23 = vpop.permute.xlu0 %1790 }
 0x8d8   : > { %v1915_v7 = vpop.permute.xlu0 %1914 }
 0x8da   : > { %v3393_v30 = vpop.eup %3392 }
 0x8db   : > { %v1783_v27 = vrot.slane %v3393_v30, %v3563_v10 }
 0x8dd   : > { %v1785_v31 = vmul.f32 %v1783_v27, %v1763_v56  ;;  %v1931_v22 = vpop.permute.xlu0 %1930 }
 0x8df   : > { %v1794_v26 = vcombine.high %v1785_v31, %v1785_v31 }
 0x8e1   : > { %3177 = vmatprep.subr.msk.mxu1 %vm676_vm0, %v1794_v26 }
 0x8e2   : > { %3178 = vmatpush1.msk.msra.mxu1 %vm676_vm0, %v1785_v31  ;;  %v1947_v38 = vpop.permute.xlu0 %1946 }
 0x8e3   : > { %3179 = vmatmul.mubr.msk.f32.vlgmr.msra.gmra.mrb[4].mxu1 %vm732_vm1, %v1786_v61 }
 0x8e4   : > { %2110 = vmatprep.mubr.f32.mxu1 %v3410_v20 }
 0x8e7   : > { %v1963_v62 = vpop.permute.xlu0 %1962 }
 0x8ec   : > { %v1979_v56 = vpop.permute.xlu0 %1978 }
 0x8f1   : > { %v1995_v26 = vpop.permute.xlu0 %1994 }
 0x9b6   : > { %v1868_v49 = vpop.f32.mrb[4].mxu1 }
 0x9b7   : > { %v1869_v42 = vadd.f32 %v1868_v49, %v1791_v23  ;;  %v1870_v25 = vpop.f32.mrb[5].mxu1 }
 0x9b8   : > { %v1871_v10 = vadd.f32 %v1870_v25, %v1791_v23 }
 0x9b9   : > { %2001 = vrot.lane.b32.xlu0 %v1869_v42, %s4467_s27  ;;  %1889 = vrot.lane.b32.xlu1 %v1869_v42, %s4475_s11  ;;  %v1880_v9 = vmul.f32 %v1878_v33, %v1869_v42 }
 0x9ba   : > { %v1881_v35 = vmul.f32 %v1878_v33, %v1871_v10 }
 0x9bb   : > { %v1887_v27 = vadd.f32 %v1885_v39, %v1880_v9 }
 0x9bc   : > { %v1888_v31 = vadd.f32 %v1885_v39, %v1881_v35 }
 0x9bd   : > { %1905 = vrot.lane.b32.xlu1 %v1869_v42, %s4476_s29  ;;  %2039 = vperm.xlu0 %3366, %v2036_v0  }
 0x9c1   : > { %1921 = vrot.lane.b32.xlu1 %v1869_v42, %s4470_s6 }
 0x9c5   : > { %1937 = vrot.lane.b32.xlu1 %v1869_v42, %s4471_s0 }
 0x9c9   : > { %1953 = vrot.lane.b32.xlu1 %v1869_v42, %s4464_s26 }
 0x9cd   : > { %1969 = vrot.lane.b32.xlu1 %v1869_v42, %s4465_s22 }
 0x9d1   : > { %1985 = vrot.lane.b32.xlu1 %v1869_v42, %s4466_s1 }
 0x9d5   : > { %1891 = vrot.lane.b32.xlu1 %v1871_v10, %s4475_s11 }
 0x9d9   : > { %1907 = vrot.lane.b32.xlu1 %v1871_v10, %s4476_s29 }
 0x9dd   : > { %1923 = vrot.lane.b32.xlu1 %v1871_v10, %s4470_s6 }
 0x9e1   : > { %1939 = vrot.lane.b32.xlu1 %v1871_v10, %s4471_s0 }
 0x9e5   : > { %1955 = vrot.lane.b32.xlu1 %v1871_v10, %s4464_s26 }
 0x9e9   : > { %1971 = vrot.lane.b32.xlu1 %v1871_v10, %s4465_s22 }
 0x9ed   : > { %1987 = vrot.lane.b32.xlu1 %v1871_v10, %s4466_s1 }
 0x9f1   : > { %2003 = vrot.lane.b32.xlu1 %v1871_v10, %s4467_s27 }
 0xa2b   : > { %v1890_v12 = vpop.permute.xlu1 %1889 }
 0xa2f   : > { %v1906_v15 = vpop.permute.xlu1 %1905 }
 0xa33   : > { %v1922_v37 = vpop.permute.xlu1 %1921 }
 0xa37   : > { %v1938_v34 = vpop.permute.xlu1 %1937 }
 0xa3b   : > { %v1954_v44 = vpop.permute.xlu1 %1953 }
 0xa3f   : > { %v1970_v50 = vpop.permute.xlu1 %1969 }
 0xa43   : > { %v1986_v57 = vpop.permute.xlu1 %1985 }
 0xa47   : > { %v1892_v48 = vpop.permute.xlu1 %1891 }
 0xa48   : > { %v1893_v54 = vsel %vm862_vm2, %v1890_v12, %v1892_v48  ;;  %v1894_v6 = vsel %vm862_vm2, %v1892_v48, %v1890_v12 }
 0xa49   : > { %v1895_v47 = vmul.f32 %v1894_v6, %v3656_v4  ;;  %v1896_v63 = vmul.f32 %v1893_v54, %v3659_v5 }
 0xa4b   : > { %v1908_v16 = vpop.permute.xlu1 %1907  ;;  %v1901_v17 = vmul.f32 %v1899_v21, %v1895_v47  ;;  %v1902_v51 = vmul.f32 %v1899_v21, %v1896_v63 }
 0xa4c   : > { %v1909_v36 = vsel %vm903_vm3, %v1906_v15, %v1908_v16  ;;  %v1910_v58 = vsel %vm903_vm3, %v1908_v16, %v1906_v15 }
 0xa4d   : > { %v1911_v41 = vmul.f32 %v1910_v58, %v3670_v13  ;;  %v1912_v40 = vmul.f32 %v1909_v36, %v3673_v14  ;;  %v1903_v33 = vadd.f32 %v1901_v17, %v1887_v27  ;;  %v1904_v21 = vadd.f32 %v1902_v51, %v1888_v31 }
 0xa4f   : > { %v1924_v11 = vpop.permute.xlu1 %1923  ;;  %v1917_v61 = vmul.f32 %v1915_v7, %v1911_v41  ;;  %v1918_v23 = vmul.f32 %v1915_v7, %v1912_v40 }
 0xa50   : > { %v1925_v43 = vsel %vm944_vm4, %v1922_v37, %v1924_v11  ;;  %v1926_v55 = vsel %vm944_vm4, %v1924_v11, %v1922_v37 }
 0xa51   : > { %v1927_v19 = vmul.f32 %v1926_v55, %v3684_v24  ;;  %v1928_v30 = vmul.f32 %v1925_v43, %v3687_v32  ;;  %v1919_v37 = vadd.f32 %v1917_v61, %v1903_v33  ;;  %v1920_v39 = vadd.f32 %v1918_v23, %v1904_v21 }
 0xa53   : > { %v1940_v28 = vpop.permute.xlu1 %1939  ;;  %v1933_v12 = vmul.f32 %v1931_v22, %v1927_v19  ;;  %v1934_v15 = vmul.f32 %v1931_v22, %v1928_v30 }
 0xa54   : > { %v1941_v29 = vsel %vm985_vm5, %v1938_v34, %v1940_v28  ;;  %v1942_v3 = vsel %vm985_vm5, %v1940_v28, %v1938_v34 }
 0xa55   : > { %v1943_v42 = vmul.f32 %v1942_v3, %v3699_v45  ;;  %v1944_v25 = vmul.f32 %v1941_v29, %v3702_v46  ;;  %v1935_v58 = vadd.f32 %v1933_v12, %v1919_v37  ;;  %v1936_v47 = vadd.f32 %v1934_v15, %v1920_v39 }
 0xa57   : > { %v1956_v49 = vpop.permute.xlu1 %1955  ;;  %v1949_v16 = vmul.f32 %v1947_v38, %v1943_v42  ;;  %v1950_v54 = vmul.f32 %v1947_v38, %v1944_v25 }
 0xa58   : > { %v1957_v10 = vsel %vm1026_vm6, %v1954_v44, %v1956_v49  ;;  %v1958_v0 = vsel %vm1026_vm6, %v1956_v49, %v1954_v44  ;;  %v2011_v44 = vpop.permute.xlu0 %2010 }
 0xa59   : > { %v1959_v34 = vmul.f32 %v1957_v10, %v3712_v1  ;;  %v1960_v7 = vmul.f32 %v1958_v0, %v3715_v2  ;;  %v1951_v41 = vadd.f32 %v1949_v16, %v1935_v58  ;;  %v1952_v40 = vadd.f32 %v1950_v54, %v1936_v47 }
 0xa5b   : > { %v1972_v48 = vpop.permute.xlu1 %1971  ;;  %v1965_v63 = vmul.f32 %v1963_v62, %v1959_v34  ;;  %v1966_v9 = vmul.f32 %v1963_v62, %v1960_v7 }
 0xa5c   : > { %v1973_v6 = vsel %vm1067_vm7, %v1970_v50, %v1972_v48  ;;  %v1974_v11 = vsel %vm1067_vm7, %v1972_v48, %v1970_v50  ;;  %v2002_v51 = vpop.permute.xlu0 %2001 }
 0xa5d   : > { %v1975_v36 = vmul.f32 %v1973_v6, %v3721_v8  ;;  %v1976_v22 = vmul.f32 %v1974_v11, %v3732_v18  ;;  %v1967_v29 = vadd.f32 %v1965_v63, %v1951_v41  ;;  %v1968_v3 = vadd.f32 %v1966_v9, %v1952_v40 }
 0xa5f   : > { %v1988_v35 = vpop.permute.xlu1 %1987  ;;  %v1981_v55 = vmul.f32 %v1979_v56, %v1975_v36  ;;  %v1982_v50 = vmul.f32 %v1979_v56, %v1976_v22  ;;  %v4135_v56 = vld [vmem:[%s4463_s3 + $0x10] ss:$0 sm:$0xff] }
 0xa60   : > { %v1989_v38 = vsel %vm1108_vm8, %v1986_v57, %v1988_v35  ;;  %v1990_v43 = vsel %vm1108_vm8, %v1988_v35, %v1986_v57  ;;  %v2035_v35 = vld [vmem:[%s4416_s16] sm:$0xf]  ;;  %v2040_v41 = vpop.permute.xlu0 %2039 }
 0xa61   : > { %v1991_v28 = vmul.f32 %v1989_v38, %v3751_v52  ;;  %v1992_v17 = vmul.f32 %v1990_v43, %v3754_v53  ;;  %v1983_v61 = vadd.f32 %v1981_v55, %v1967_v29  ;;  %v1984_v57 = vadd.f32 %v1982_v50, %v1968_v3 }
 0xa63   : > { %v1997_v19 = vmul.f32 %v1995_v26, %v1991_v28  ;;  %v1998_v62 = vmul.f32 %v1995_v26, %v1992_v17  ;;  %v2004_v30 = vpop.permute.xlu1 %2003  ;;  %v4141_v26 = vld [vmem:[%s4463_s3 + $0x18] ss:$0 sm:$0xff] }
 0xa64   : > { %v2005_v27 = vsel %vm1149_vm9, %v2002_v51, %v2004_v30  ;;  %v2006_v31 = vsel %vm1149_vm9, %v2004_v30, %v2002_v51  ;;  %v2126_v51 = vld [vmem:[%s4418_s18 + $0x20] sm:$0xff] }
 0xa65   : > { %v2007_v23 = vmul.f32 %v4135_v56, %v2005_v27  ;;  %v2008_v49 = vmul.f32 %v4141_v26, %v2006_v31  ;;  %v1999_v42 = vadd.f32 %v1997_v19, %v1983_v61  ;;  %v2000_v25 = vadd.f32 %v1998_v62, %v1984_v57  ;;  %v2122_v61 = vld [vmem:[%s4418_s18] sm:$0xff] }
 0xa67   : > { %v2013_v10 = vmul.f32 %v2011_v44, %v2007_v23  ;;  %v2014_v0 = vmul.f32 %v2011_v44, %v2008_v49 }
 0xa69   : > { %v2015_v33 = vadd.f32 %v2013_v10, %v1999_v42  ;;  %v2016_v21 = vadd.f32 %v2014_v0, %v2000_v25 }
 0xa6b   : > { %v2017_v12 = vmul.f32 %v2015_v33, %v2015_v33  ;;  %v2018_v15 = vmul.f32 %v2016_v21, %v2016_v21 }
 0xa6d   : > { %v2019_v37 = vmul.f32 %v2017_v12, %v2015_v33  ;;  %v2020_v39 = vmul.f32 %v2018_v15, %v2016_v21 }
 0xa6f   : > { %v2021_v34 = vmul.f32 0.044715, %v2019_v37  ;;  %v2022_v7 = vmul.f32 0.044715, %v2020_v39 }
 0xa71   : > { %v2024_v48 = vadd.f32 %v2022_v7, %v2016_v21  ;;  %v2023_v16 = vadd.f32 %v2021_v34, %v2015_v33 }
 0xa73   : > { %v2026_v54 = vmul.f32 0.7978846, %v2024_v48  ;;  %v2025_v6 = vmul.f32 0.7978846, %v2023_v16 }
 0xa75   : > { %3394 = vtanh.f32 %v2026_v54 }
 0xa76   : > { %3396 = vtanh.f32 %v2025_v6 }
 0xa7f   : > { %v3395_v11 = vpop.eup %3394 }
 0xa80   : > { %v3397_v36 = vpop.eup %3396  ;;  %v2030_v22 = vadd.f32 1.0, %v3395_v11 }
 0xa81   : > { %v2029_v58 = vadd.f32 1.0, %v3397_v36 }
 0xa82   : > { %v2032_v47 = vmul.f32 0.5, %v2030_v22 }
 0xa83   : > { %v2031_v44 = vmul.f32 0.5, %v2029_v58 }
 0xa84   : > { %v2034_v63 = vmul.f32 %v2032_v47, %v2016_v21 }
 0xa85   : > { %v2033_v9 = vmul.f32 %v2031_v44, %v2015_v33 }
 0xa86   : > { %2046 = vmatprep.subr.mxu1 %v2034_v63 }
 0xa87   : > { %2047 = vmatpush1.msra.mxu1 %v2033_v9 }
 0xa88   : > { %3180 = vmatmul.mubr.msk.f32.vlgmr.msra.gmra.mrb[6].mxu1 %vm2042_vm11, %v2035_v35 }
 0xb5b   : > { %v2112_v40 = vpop.f32.mrb[6].mxu1 }
 0xb5c   : > { %v2113_v38 = vadd.f32 %v2112_v40, %v2040_v41  ;;  %v2114_v43 = vpop.f32.mrb[7].mxu1 }
 0xb5d   : > { %v2115_v55 = vadd.f32 %v2114_v43, %v2040_v41 }
 0xb5f   : > { %v2119_v50 = vcombine.low %v2113_v38, %v2115_v55  ;;  %v2129_v55 = vld [vmem:[%s4418_s18 + $0x38] sm:$0xff] }
 0xb61   : > { %v2121_v28 = vadd.f32 %v2119_v50, %v4030_v60  ;;  %v2131_v60 = vld [vmem:[%s4419_s19] sm:$0xff] }
 0xb63   : > { %2308 = vrot.lane.b32.xlu0 %v2121_v28, %s4476_s29  ;;  %2218 = vrot.lane.b32.xlu1 %v2121_v28, %s4475_s11  ;;  %v2138_v17 = vcombine.high %v2121_v28, %v2121_v28 }
 0xb65   : > { %3181 = vmatprep.subr.msk.mxu0 %vm676_vm0, %v2138_v17 }
 0xb66   : > { %3182 = vmatpush1.msk.msra.mxu0 %vm676_vm0, %v2121_v28 }
 0xb67   : > { %2398 = vrot.lane.b32.xlu0 %v2121_v28, %s4470_s6  ;;  %2220 = vrot.lane.b32.xlu1 %v2138_v17, %s4475_s11  ;;  %s667_s11 = scalar_lea.vmem %s4421_s21, %s4478_s5 }
 0xb68   : > { %3183 = vmatmul.mubr.msk.f32.vlgmr.msra.gmra.mrb[6].mxu0 %vm732_vm1, %v2126_v51 }
 0xb69   : > { %2299 = vmatprep.mubr.f32.mxu0 %v3410_v20 }
 0xb6b   : > { %2488 = vrot.lane.b32.xlu0 %v2121_v28, %s4471_s0  ;;  %2310 = vrot.lane.b32.xlu1 %v2138_v17, %s4476_s29 }
 0xb6f   : > { %2578 = vrot.lane.b32.xlu0 %v2121_v28, %s4464_s26  ;;  %2400 = vrot.lane.b32.xlu1 %v2138_v17, %s4470_s6  ;;  %s4477_s6 = sld [smem:[#allocation4_spill]] }
 0xb73   : > { %2668 = vrot.lane.b32.xlu0 %v2121_v28, %s4465_s22  ;;  %2490 = vrot.lane.b32.xlu1 %v2138_v17, %s4471_s0 }
 0xb77   : > { %2758 = vrot.lane.b32.xlu0 %v2121_v28, %s4466_s1  ;;  %2580 = vrot.lane.b32.xlu1 %v2138_v17, %s4464_s26 }
 0xb7b   : > { %2848 = vrot.lane.b32.xlu0 %v2121_v28, %s4467_s27  ;;  %2670 = vrot.lane.b32.xlu1 %v2138_v17, %s4465_s22 }
 0xb7f   : > { %2134 = vperm.xlu0 %3366, %v2131_v60   ;;  %2760 = vrot.lane.b32.xlu1 %v2138_v17, %s4466_s1 }
 0xb83   : > { %2850 = vrot.lane.b32.xlu1 %v2138_v17, %s4467_s27 }
 0xbd5   : > { %v2219_v29 = vpop.permute.xlu1 %2218  ;;  %v2309_v3 = vpop.permute.xlu0 %2308 }
 0xbd9   : > { %v2221_v19 = vpop.permute.xlu1 %2220  ;;  %v2399_v42 = vpop.permute.xlu0 %2398 }
 0xbda   : > { %v2222_v62 = vsel %vm862_vm2, %v2219_v29, %v2221_v19  ;;  %v2223_v30 = vsel %vm862_vm2, %v2221_v19, %v2219_v29  ;;  %v2979_v29 = vld [vmem:[%s4477_s6 + $0x88] sm:$0xff] }
 0xbdb   : > { %v2224_v27 = vmul.f32 %v2223_v30, %v3656_v4  ;;  %v2225_v31 = vmul.f32 %v2222_v62, %v3659_v5  ;;  %v2963_v30 = vld [vmem:[%s4477_s6 + $0x8] sm:$0xff] }
 0xbdd   : > { %v2311_v57 = vpop.permute.xlu1 %2310  ;;  %3184 = vmatprep.subr.msk.mxu0 %vm676_vm0, %v2225_v31  ;;  %v2981_v31 = vld [vmem:[%s4477_s6 + $0x98] sm:$0xff] }
 0xbde   : > { %v2312_v23 = vsel %vm903_vm3, %v2309_v3, %v2311_v57  ;;  %v2313_v49 = vsel %vm903_vm3, %v2311_v57, %v2309_v3  ;;  %3185 = vmatpush1.msk.msra.mxu0 %vm676_vm0, %v2224_v27  ;;  %v2962_v3 = vld [vmem:[%s4477_s6] sm:$0xff]  ;;  %v2980_v27 = vld [vmem:[%s4477_s6 + $0x90] sm:$0xff] }
 0xbdf   : > { %v2314_v4 = vmul.f32 %v2313_v49, %v3670_v13  ;;  %v2315_v5 = vmul.f32 %v2312_v23, %v3673_v14  ;;  %3186 = vmatmul.mubr.msk.f32.vlgmr.msra.gmra.mrb[6].mxu0 %vm732_vm1, %v2122_v61  ;;  %v2123_v13 = vld [vmem:[%s4418_s18 + $0x8] sm:$0xff]  ;;  %v2489_v14 = vpop.permute.xlu0 %2488  ;;  %v3249_v57 = vpack.c.bf16 %v2963_v30, %v2962_v3  ;;  %v3251_v23 = vpack.c.bf16 %v2981_v31, %v2980_v27  ;;  %v2964_v49 = vld [vmem:[%s4477_s6 + $0x10] sm:$0xff] }
 0xbe0   : > { %2389 = vmatprep.mubr.f32.mxu0 %v3410_v20 }
 0xbe1   : > { %v2401_v25 = vpop.permute.xlu1 %2400  ;;  %3187 = vmatprep.subr.msk.mxu0 %vm676_vm0, %v2315_v5 }
 0xbe2   : > { %v2402_v10 = vsel %vm944_vm4, %v2399_v42, %v2401_v25  ;;  %3188 = vmatpush1.msk.msra.mxu0 %vm676_vm0, %v2314_v4  ;;  %v2403_v0 = vsel %vm944_vm4, %v2401_v25, %v2399_v42  ;;  %v2965_v42 = vld [vmem:[%s4477_s6 + $0x18] sm:$0xff]  ;;  %v2982_v4 = vld [vmem:[%s4477_s6 + $0xa0] sm:$0xff]  ;;  %v2983_v25 = vld [vmem:[%s4477_s6 + $0xa8] sm:$0xff] }
 0xbe3   : > { %v2405_v33 = vmul.f32 %v2402_v10, %v3687_v32  ;;  %v2404_v12 = vmul.f32 %v2403_v0, %v3684_v24  ;;  %v2579_v39 = vpop.permute.xlu0 %2578  ;;  %v3253_v0 = vpack.c.bf16 %v2965_v42, %v2964_v49 }
 0xbe5   : > { %v2491_v21 = vpop.permute.xlu1 %2490  ;;  %3190 = vmatprep.subr.msk.mxu0 %vm676_vm0, %v2405_v33  ;;  %v3255_v33 = vpack.c.bf16 %v2983_v25, %v2982_v4 }
 0xbe6   : > { %v2492_v15 = vsel %vm985_vm5, %v2489_v14, %v2491_v21  ;;  %v2493_v34 = vsel %vm985_vm5, %v2491_v21, %v2489_v14  ;;  %v2967_v14 = vld [vmem:[%s4477_s6 + $0x28] sm:$0xff]  ;;  %v2984_v21 = vld [vmem:[%s4477_s6 + $0xb0] sm:$0xff] }
 0xbe7   : > { %v2495_v37 = vmul.f32 %v2492_v15, %v3702_v46  ;;  %3189 = vmatmul.mubr.msk.f32.vlgmr.msra.gmra.mrb[6].mxu0 %vm732_vm1, %v2123_v13  ;;  %v2124_v46 = vld [vmem:[%s4418_s18 + $0x10] sm:$0xff]  ;;  %v2494_v7 = vmul.f32 %v2493_v34, %v3699_v45  ;;  %v2669_v54 = vpop.permute.xlu0 %2668  ;;  %v2125_v45 = vld [vmem:[%s4418_s18 + $0x18] sm:$0xff]  ;;  %v2966_v13 = vld [vmem:[%s4477_s6 + $0x20] sm:$0xff] }
 0xbe8   : > { %3191 = vmatpush1.msk.msra.mxu0 %vm676_vm0, %v2404_v12  ;;  %2479 = vmatprep.mubr.f32.mxu0 %v3410_v20  ;;  %v2985_v12 = vld [vmem:[%s4477_s6 + $0xb8] sm:$0xff]  ;;  %v3257_v15 = vpack.c.bf16 %v2967_v14, %v2966_v13  ;;  %v2986_v34 = vld [vmem:[%s4477_s6 + $0xc0] sm:$0xff] }
 0xbe9   : > { %v2581_v32 = vpop.permute.xlu1 %2580  ;;  %3193 = vmatprep.subr.msk.mxu0 %vm676_vm0, %v2495_v37  ;;  %v3259_v37 = vpack.c.bf16 %v2985_v12, %v2984_v21 }
 0xbea   : > { %v2583_v24 = vsel %vm1026_vm6, %v2581_v32, %v2579_v39  ;;  %v2582_v6 = vsel %vm1026_vm6, %v2579_v39, %v2581_v32  ;;  %v2968_v32 = vld [vmem:[%s4477_s6 + $0x30] sm:$0xff]  ;;  %v2969_v39 = vld [vmem:[%s4477_s6 + $0x38] sm:$0xff] }
 0xbeb   : > { %v2585_v48 = vmul.f32 %v2583_v24, %v3715_v2  ;;  %v2584_v2 = vmul.f32 %v2582_v6, %v3712_v1  ;;  %v2759_v58 = vpop.permute.xlu0 %2758  ;;  %v2127_v1 = vld [vmem:[%s4418_s18 + $0x28] sm:$0xff]  ;;  %v2989_v6 = vld [vmem:[%s4477_s6 + $0xd8] sm:$0xff] }
 0xbec   : > { %v2987_v24 = vld [vmem:[%s4477_s6 + $0xc8] sm:$0xff] }
 0xbed   : > { %v2671_v16 = vpop.permute.xlu1 %2670 }
 0xbee   : > { %v2673_v11 = vsel %vm1067_vm7, %v2671_v16, %v2669_v54  ;;  %v2672_v47 = vsel %vm1067_vm7, %v2669_v54, %v2671_v16  ;;  %v2971_v16 = vld [vmem:[%s4477_s6 + $0x48] sm:$0xff]  ;;  %v2988_v54 = vld [vmem:[%s4477_s6 + $0xd0] sm:$0xff] }
 0xbef   : > { %3192 = vmatmul.mubr.msk.f32.vlgmr.msra.gmra.mrb[6].mxu0 %vm732_vm1, %v2124_v46  ;;  %v2675_v36 = vmul.f32 %v2673_v11, %v3732_v18  ;;  %v2674_v18 = vmul.f32 %v2672_v47, %v3721_v8  ;;  %v2849_v35 = vpop.permute.xlu0 %2848  ;;  %v2128_v8 = vld [vmem:[%s4418_s18 + $0x30] sm:$0xff]  ;;  %v3261_v46 = vpack.c.bf16 %v2969_v39, %v2968_v32 }
 0xbf0   : > { %3194 = vmatpush1.msk.msra.mxu0 %vm676_vm0, %v2494_v7  ;;  %2569 = vmatprep.mubr.f32.mxu0 %v3410_v20  ;;  %v3263_v7 = vpack.c.bf16 %v2987_v24, %v2986_v34 }
 0xbf1   : > { %3196 = vmatprep.subr.msk.mxu0 %vm676_vm0, %v2585_v48  ;;  %v2761_v22 = vpop.permute.xlu1 %2760  ;;  %v2970_v48 = vld [vmem:[%s4477_s6 + $0x40] sm:$0xff] }
 0xbf2   : > { %v2763_v44 = vsel %vm1108_vm8, %v2761_v22, %v2759_v58  ;;  %v2762_v41 = vsel %vm1108_vm8, %v2759_v58, %v2761_v22  ;;  %v3265_v11 = vpack.c.bf16 %v2971_v16, %v2970_v48  ;;  %v2990_v22 = vld [vmem:[%s4477_s6 + $0xe0] sm:$0xff]  ;;  %v2991_v58 = vld [vmem:[%s4477_s6 + $0xe8] sm:$0xff] }
 0xbf3   : > { %v2765_v63 = vmul.f32 %v2763_v44, %v3754_v53  ;;  %v2764_v53 = vmul.f32 %v2762_v41, %v3751_v52  ;;  %v2130_v52 = vld [vmem:[%s4418_s18 + $0x40] sm:$0xff]  ;;  %v3271_v44 = vpack.c.bf16 %v2991_v58, %v2990_v22 }
 0xbf5   : > { %v2851_v9 = vpop.permute.xlu1 %2850 }
 0xbf6   : > { %v2853_v40 = vsel %vm1149_vm9, %v2851_v9, %v2849_v35  ;;  %v2852_v43 = vsel %vm1149_vm9, %v2849_v35, %v2851_v9  ;;  %v2992_v9 = vld [vmem:[%s4477_s6 + $0xf0] sm:$0xff]  ;;  %v2993_v35 = vld [vmem:[%s4477_s6 + $0xf8] sm:$0xff] }
 0xbf7   : > { %3195 = vmatmul.mubr.msk.f32.vlgmr.msra.gmra.mrb[6].mxu0 %vm732_vm1, %v2125_v45  ;;  %v2855_v38 = vmul.f32 %v4141_v26, %v2853_v40  ;;  %v2854_v50 = vmul.f32 %v4135_v56, %v2852_v43  ;;  %v3267_v45 = vpack.c.bf16 %v2989_v6, %v2988_v54  ;;  %v3275_v41 = vpack.c.bf16 %v2993_v35, %v2992_v9  ;;  %v2976_v40 = vld [vmem:[%s4477_s6 + $0x70] sm:$0xff] }
 0xbf8   : > { %3197 = vmatpush1.msk.msra.mxu0 %vm676_vm0, %v2584_v2  ;;  %2659 = vmatprep.mubr.f32.mxu0 %v3410_v20  ;;  %v2972_v2 = vld [vmem:[%s4477_s6 + $0x50] sm:$0xff] }
 0xbf9   : > { %3199 = vmatprep.subr.msk.mxu0 %vm676_vm0, %v2675_v36  ;;  %v2973_v36 = vld [vmem:[%s4477_s6 + $0x58] sm:$0xff] }
 0xbfa   : > { %v3269_v47 = vpack.c.bf16 %v2973_v36, %v2972_v2 }
 0xbfe   : > { %v2135_v26 = vpop.permute.xlu0 %2134 }
 0xbff   : > { %3198 = vmatmul.mubr.msk.f32.vlgmr.msra.gmra.mrb[6].mxu0 %vm732_vm1, %v2127_v1  ;;  %v2974_v1 = vld [vmem:[%s4477_s6 + $0x60] sm:$0xff] }
 0xc00   : > { %3200 = vmatpush1.msk.msra.mxu0 %vm676_vm0, %v2674_v18  ;;  %2749 = vmatprep.mubr.f32.mxu0 %v3410_v20  ;;  %v2975_v18 = vld [vmem:[%s4477_s6 + $0x68] sm:$0xff] }
 0xc01   : > { %3202 = vmatprep.subr.msk.mxu0 %vm676_vm0, %v2765_v63  ;;  %v3273_v63 = vpack.c.bf16 %v2975_v18, %v2974_v1 }
 0xc07   : > { %3201 = vmatmul.mubr.msk.f32.vlgmr.msra.gmra.mrb[6].mxu0 %vm732_vm1, %v2128_v8  ;;  %v2977_v8 = vld [vmem:[%s4477_s6 + $0x78] sm:$0xff] }
 0xc08   : > { %3203 = vmatpush1.msk.msra.mxu0 %vm676_vm0, %v2764_v53  ;;  %2839 = vmatprep.mubr.f32.mxu0 %v3410_v20  ;;  %v3277_v53 = vpack.c.bf16 %v2977_v8, %v2976_v40 }
 0xc09   : > { %3205 = vmatprep.subr.msk.mxu0 %vm676_vm0, %v2855_v38 }
 0xc0f   : > { %3204 = vmatmul.mubr.msk.f32.vlgmr.msra.gmra.mrb[6].mxu0 %vm732_vm1, %v2129_v55 }
 0xc10   : > { %3206 = vmatpush1.msk.msra.mxu0 %vm676_vm0, %v2854_v50  ;;  %2929 = vmatprep.mubr.f32.mxu0 %v3410_v20  ;;  %v2978_v20 = vld [vmem:[%s4477_s6 + $0x80] sm:$0xff] }
 0xc11   : > { %v3247_v62 = vpack.c.bf16 %v2979_v29, %v2978_v20 }
 0xc13   : > { %3248 = vmatprep.subr.bf16.mxu1 %v3247_v62 }
 0xc14   : > { %3250 = vmatpush3.bf16.msra.mxu1 %v3249_v57 }
 0xc15   : > { %3252 = vmatprep.subr.bf16.mxu1 %v3251_v23 }
 0xc17   : > { %3207 = vmatmul.mubr.msk.f32.vlgmr.msra.gmra.mrb[6].mxu0 %vm732_vm1, %v2130_v52  ;;  %vm3064_vm1 = vcmask 523264  }
 0xc18   : > { %3254 = vmatpush3.bf16.msra.mxu1 %v3253_v0 }
 0xc19   : > { %3256 = vmatprep.subr.bf16.mxu1 %v3255_v33 }
 0xc1c   : > { %3258 = vmatpush3.bf16.msra.mxu1 %v3257_v15 }
 0xc1d   : > { %3260 = vmatprep.subr.bf16.mxu1 %v3259_v37 }
 0xc20   : > { %3262 = vmatpush3.bf16.msra.mxu1 %v3261_v46 }
 0xc21   : > { %3264 = vmatprep.subr.bf16.mxu1 %v3263_v7 }
 0xc24   : > { %3266 = vmatpush3.bf16.msra.mxu1 %v3265_v11 }
 0xc25   : > { %3268 = vmatprep.subr.bf16.mxu1 %v3267_v45 }
 0xc28   : > { %3270 = vmatpush3.bf16.msra.mxu1 %v3269_v47 }
 0xc29   : > { %3272 = vmatprep.subr.bf16.mxu1 %v3271_v44 }
 0xc2c   : > { %3274 = vmatpush3.bf16.msra.mxu1 %v3273_v63 }
 0xc2d   : > { %3276 = vmatprep.subr.bf16.mxu1 %v3275_v41 }
 0xc30   : > { %3278 = vmatpush3.bf16.msra.mxu1 %v3277_v53 }
 0xcea   : > { %v2931_v28 = vpop.f32.mrb[6].mxu0 }
 0xceb   : > { %v3279_v17 = vadd.f32 %v2931_v28, %v2135_v26  ;;  %v2933_v51 = vpop.f32.mrb[7].mxu0 }
 0xcec   : > { %v3280_v60 = vadd.f32 %v2933_v51, %v2135_v26 }
 0xced   : > { %vm2938_vm2 = vcmp.ge.f32.partialorder %v3279_v17, 0.0  ;;  %v2940_v56 = vmul.f32 0.2, %v3279_v17 }
 0xcee   : > { %vm2939_vm0 = vcmp.ge.f32.partialorder %v3280_v60, 0.0  ;;  %v2941_v19 = vmul.f32 0.2, %v3280_v60 }
 0xcef   : > { %v4299_v61 = vsel %vm2938_vm2, %v3279_v17, %v2940_v56 }
 0xcf0   : > { %2944 = vst [vmem:[%s663_s10] sm:$0xff] %v4299_v61  ;;  %v2943_v5 = vsel %vm2939_vm0, %v3280_v60, %v2941_v19 }
 0xcf1   : > { %v3367_v10 = vpack.i.bf16 %v2943_v5, %v4299_v61  ;;  %2945 = vst [vmem:[%s663_s10 + $0x8] sm:$0xff] %v2943_v5 }
 0xcf3   : > { %3368 = vrot.lane.b32.xlu1 %v3367_v10, %s4464_s26 }
 0xd65   : > { %v3369_v38 = vpop.permute.xlu1 %3368 }
 0xd66   : > { %v3371_v43 = vunpack.i.h.bf16 %v3369_v38  ;;  %v3370_v55 = vunpack.i.l.bf16 %v3369_v38 }
 0xd68   : > { %v2950_v50 = vsel %vm1026_vm6, %v3370_v55, %v3371_v43  ;;  %v2951_v52 = vsel %vm1026_vm6, %v3371_v43, %v3370_v55 }
 0xd69   : > { %v2952_v26 = vmax.f32 %v4299_v61, %v2950_v50  ;;  %v2953_v28 = vmax.f32 %v2943_v5, %v2951_v52 }
 0xd6b   : > { %v3372_v17 = vpack.i.bf16 %v2953_v28, %v2952_v26 }
 0xd6d   : > { %3373 = vrot.lane.b32.xlu0 %v3372_v17, %s4466_s1 }
 0xddf   : > { %v3374_v51 = vpop.permute.xlu0 %3373 }
 0xde0   : > { %v3376_v60 = vunpack.i.h.bf16 %v3374_v51  ;;  %v3375_v56 = vunpack.i.l.bf16 %v3374_v51 }
 0xde2   : > { %v2958_v20 = vsel %vm1108_vm8, %v3375_v56, %v3376_v60  ;;  %v2959_v29 = vsel %vm1108_vm8, %v3376_v60, %v3375_v56 }
 0xde3   : > { %v2960_v3 = vmax.f32 %v2952_v26, %v2958_v20  ;;  %v2961_v19 = vmax.f32 %v2953_v28, %v2959_v29 }
 0xde5   : > { %3058 = vmatprep.mubr.f32.mxu1 %v2961_v19 }
 0xde6   : > { %3059 = vmatmul.mubr.f32.vlgmr.msra.gmra.mrb[8].mxu1 %v2960_v3 }
 0xeb9   : > { %v3244_v62 = vpop.f32.mrb[8].mxu1 }
 0xeba   : > { %v3245_v30 = vpop.f32.mrb[9].mxu1 }
 0xebb   : > { %v3246_v27 = vadd.f32 %v3245_v30, %v3244_v62 }
 0xebd   : > { %3065 = vst.msk [vmem:[%s667_s11] sm:$0xff] %vm3064_vm1, %v3246_v27 }
 0xebe PF: > { %s32_s2 = sadd.s32 1, %s3407_s2  }
 0xebf   : > { %p29_p4 = scmp.ge.s32.totalorder %s32_s2, 4  }
 0xec1   :  { %31 = sbr.rel (!%p29_p4) target bundleno = 10 (0xa), region = 142 }

</bundles_post_ra>
